<compile_context>
chip_gen: v5e
topology: v5e:2x2
jax: 0.10.0
libtpu: 0.0.40
codegen_flags: <defaults>
</compile_context>

<pallas_src>
import functools
import math

import jax
import jax.numpy as jnp
from jax.experimental import pallas as pl
from jax.experimental.pallas import tpu as pltpu

# ---------------- problem sizes --------------------------------------------
B = 2                   # batch (module spec: x is [B, 1, 28, 28])
IMG = 28
D_REAL = IMG * IMG      # 784 real pixels (C=1)
DP = 896                # 7 * 128  lane-dense padded pixel count
H = 128                 # hidden width of the noise-estimating MLP
NUM_CLASSES = 10
NUM_STEPS = 1000
BETA_START, BETA_END = 1e-4, 0.02


def _round_up(n, m):
    return ((n + m - 1) // m) * m


def _tile_m_for(b_real):
    # round_up(B, 32) keeps bf16 (16,128) sublane packing and clean f32
    # (8,128) tiles; cap at 128 (v5e MXU is 128-wide, and larger M only
    # inflates the f32 intermediates).
    return min(128, max(32, _round_up(b_real, 32)))


# ---------------- fused Pallas kernel ---------------------------------------
def diffusion_loss_kernel(
    x_ref,       # [TM, DP]  f32   clean image tile (zero-padded rows/cols)
    noise_ref,   # [TM, DP]  f32   gaussian noise tile (zero-padded)
    scale_ref,   # [TM, 2]   f32   [sqrt(alpha_bar_t) | sqrt(1 - alpha_bar_t)]
    cond_ref,    # [TM, 2H]  bf16  [time_emb | label_emb]
    w1_ref,      # [DP, H]   bf16  padded rows are zero          (resident)
    wc_ref,      # [2H, H]   bf16  [Wt ; Wy]                     (resident)
    b1_ref,      # [1, H]    f32                                 (resident)
    w2_ref,      # [H, DP]   bf16  padded cols are zero          (resident)
    b2_ref,      # [1, DP]   f32   padded cols are zero          (resident)
    loss_ref,    # [1, 1]    f32   accumulated scalar loss (output)
    *,
    inv_count,   # python float: 1 / (B_real * 784)
    b_real,      # python int: real (unpadded) batch size
    tile_m,      # python int: rows per tile
):
    i = pl.program_id(0)

    @pl.when(i == 0)
    def _init():
        loss_ref[...] = jnp.zeros_like(loss_ref)

    x = x_ref[...]
    noise = noise_ref[...]

    # --- VarianceScheduler.add_noise (f32 elementwise) -----------------------
    sab = scale_ref[:, 0:1]                                          # [TM, 1]
    s1mab = scale_ref[:, 1:2]                                        # [TM, 1]
    noisy = sab * x + s1mab * noise                                  # [TM, DP]

    # --- noise-estimating MLP -------------------------------------------------
    # Two accumulating MXU dots replace the old concat-then-one-dot scheme:
    # identical MXU pass count, no bf16 scratch round trip.
    h = jnp.dot(noisy.astype(jnp.bfloat16), w1_ref[...],
                preferred_element_type=jnp.float32)                  # [TM, H]
    h = h + jnp.dot(cond_ref[...], wc_ref[...],
                    preferred_element_type=jnp.float32)
    h = jnp.maximum(h + b1_ref[...], 0.0)                            # ReLU, f32
    est = jnp.dot(h.astype(jnp.bfloat16), w2_ref[...],
                  preferred_element_type=jnp.float32) + b2_ref[...]  # [TM, DP]

    # --- masked MSE partial sum ----------------------------------------------
    # Padded columns already contribute 0 (noise, W2 cols, b2 are zero there);
    # padded batch rows are masked out here.
    row = i * tile_m + jax.lax.broadcasted_iota(jnp.int32, (tile_m, 1), 0)
    row_mask = (row < b_real).astype(jnp.float32)                    # [TM, 1]
    diff = (est - noise) * row_mask
    loss_ref[...] += jnp.sum(diff * diff)

    @pl.when(i == pl.num_programs(0) - 1)
    def _finalize():
        loss_ref[...] = loss_ref[...] * jnp.float32(inv_count)


def diffusion_forward(x_p, noise_p, scale_p, cond_p, params, b_real, tile_m):
    """Grid over batch-row tiles; weights use constant index_maps so they stay
    resident in VMEM across all grid steps."""
    w1_pad, w_cond, b1, w2, b2 = params
    bp = x_p.shape[0]
    grid = (bp // tile_m,)
    inv_count = 1.0 / (b_real * D_REAL)

    kernel = functools.partial(
        diffusion_loss_kernel,
        inv_count=inv_count, b_real=b_real, tile_m=tile_m)

    flops = 2 * bp * (DP * H + 2 * H * H + H * DP)
    bytes_accessed = (
        bp * DP * 4 * 2            # x, noise (f32)
        + bp * 2 * 4               # scale (f32)
        + bp * 2 * H * 2           # cond (bf16)
        + DP * H * 2 + 2 * H * H * 2 + H * DP * 2   # bf16 weights
        + H * 4 + DP * 4 + 4)      # f32 biases + scalar out

    loss = pl.pallas_call(
        kernel,
        out_shape=jax.ShapeDtypeStruct((1, 1), jnp.float32),
        grid=grid,
        in_specs=[
            pl.BlockSpec((tile_m, DP), lambda i: (i, 0)),      # x
            pl.BlockSpec((tile_m, DP), lambda i: (i, 0)),      # noise
            pl.BlockSpec((tile_m, 2), lambda i: (i, 0)),       # [sqrt(ab)|sqrt(1-ab)]
            pl.BlockSpec((tile_m, 2 * H), lambda i: (i, 0)),   # [temb|yemb]
            pl.BlockSpec((DP, H), lambda i: (0, 0)),           # W1 (resident)
            pl.BlockSpec((2 * H, H), lambda i: (0, 0)),        # [Wt;Wy] (resident)
            pl.BlockSpec((1, H), lambda i: (0, 0)),            # b1
            pl.BlockSpec((H, DP), lambda i: (0, 0)),           # W2
            pl.BlockSpec((1, DP), lambda i: (0, 0)),           # b2
        ],
        out_specs=pl.BlockSpec((1, 1), lambda i: (0, 0)),      # loss accumulator
        compiler_params=pltpu.CompilerParams(
            dimension_semantics=("arbitrary",)),               # reduction axis
        cost_estimate=pl.CostEstimate(
            flops=flops, transcendentals=0, bytes_accessed=bytes_accessed),
    )(x_p, noise_p, scale_p, cond_p, w1_pad, w_cond, b1, w2, b2)
    return loss[0, 0]


# ---------------- glue: scheduler constants, embeddings, params --------------
def make_scheduler():
    betas = jnp.linspace(BETA_START, BETA_END, NUM_STEPS, dtype=jnp.float32)
    alphas = 1.0 - betas
    alpha_bars = jnp.cumprod(alphas)
    return betas, alphas, alpha_bars


def sinusoidal_time_embedding(t, dim):
    half = dim // 2
    freqs = jnp.exp(-math.log(10000.0) * jnp.arange(half, dtype=jnp.float32) / half)
    args = t.astype(jnp.float32)[:, None] * freqs[None, :]
    return jnp.concatenate([jnp.sin(args), jnp.cos(args)], axis=-1)  # [B, dim]


def init_params(key):
    k1, k2, k3, k4, k5 = jax.random.split(key, 5)
    w1 = jax.random.normal(k1, (D_REAL, H), jnp.float32) * (1.0 / math.sqrt(D_REAL))
    wt = jax.random.normal(k2, (H, H), jnp.float32) * (1.0 / math.sqrt(H))
    wy = jax.random.normal(k3, (H, H), jnp.float32) * (1.0 / math.sqrt(H))
    w2 = jax.random.normal(k4, (H, D_REAL), jnp.float32) * (1.0 / math.sqrt(H))
    b1 = jnp.zeros((1, H), jnp.float32)
    b2 = jnp.zeros((1, DP), jnp.float32)           # padded columns stay zero
    emb_table = jax.random.normal(k5, (NUM_CLASSES, H), jnp.float32) * 0.02

    w1_pad = jnp.pad(w1, ((0, DP - D_REAL), (0, 0))).astype(jnp.bfloat16)
    w_cond = jnp.concatenate([wt, wy], axis=0).astype(jnp.bfloat16)   # [2H, H]
    w2_pad = jnp.pad(w2, ((0, 0), (0, DP - D_REAL))).astype(jnp.bfloat16)
    return (w1_pad, w_cond, b1, w2_pad, b2), emb_table


def _pad2d(a, rows, cols):
    return jnp.pad(a, ((0, rows - a.shape[0]), (0, cols - a.shape[1])))


def diffusion_model_forward(x, y, key, params, emb_table, alpha_bars):
    """Mirrors DiffusionModel.forward: random timesteps, add noise, run the
    noise-estimating network, mean MSE. x: [B,1,28,28], y: [B]. Returns f32."""
    b_real = x.shape[0]
    k_t, k_n = jax.random.split(key)
    timesteps = jax.random.randint(k_t, (b_real,), 0, NUM_STEPS)     # torch.randint
    noise = jax.random.normal(k_n, x.shape, jnp.float32)             # torch.randn_like

    ab_t = alpha_bars[timesteps]                                     # [B]
    scale = jnp.stack([jnp.sqrt(ab_t), jnp.sqrt(1.0 - ab_t)], axis=-1)  # [B, 2]
    scale = scale.astype(jnp.float32)

    x_flat = x.reshape(b_real, D_REAL).astype(jnp.float32)
    noise_flat = noise.reshape(b_real, D_REAL).astype(jnp.float32)

    t_emb = sinusoidal_time_embedding(timesteps, H)                  # [B, H]
    y_emb = emb_table[y]                                             # [B, H]
    cond = jnp.concatenate([t_emb, y_emb], axis=-1).astype(jnp.bfloat16)

    # Pad batch rows up to a multiple of TILE_M and pixels 784 -> 896.
    tile_m = _tile_m_for(b_real)
    bp = _round_up(b_real, tile_m)
    x_p = _pad2d(x_flat, bp, DP)
    n_p = _pad2d(noise_flat, bp, DP)
    scale_p = _pad2d(scale, bp, 2)
    cond_p = _pad2d(cond, bp, 2 * H)

    return diffusion_forward(x_p, n_p, scale_p, cond_p, params, b_real, tile_m)


if __name__ == "__main__":
    key = jax.random.PRNGKey(0)
    k_param, k_x, k_y, k_fwd = jax.random.split(key, 4)

    params, emb_table = init_params(k_param)
    _, _, alpha_bars = make_scheduler()

    x = jax.random.normal(k_x, (B, 1, IMG, IMG), jnp.float32)        # [2, 1, 28, 28]
    y = jax.random.randint(k_y, (B,), 0, NUM_CLASSES)                # [2]

    forward = jax.jit(diffusion_model_forward)
    loss = forward(x, y, k_fwd, params, emb_table, alpha_bars)
    loss = jax.block_until_ready(loss)
    assert loss.shape == () and bool(jnp.isfinite(loss))
    print("KERNEL_OK")
</pallas_src>

<mosaic_0001>
module attributes {stable_mosaic.version = 11 : i64} {
  func.func @diffusion_loss_kernel(%arg0: i32, %arg1: memref<32x896xf32, #tpu.memory_space<vmem>>, %arg2: memref<32x896xf32, #tpu.memory_space<vmem>>, %arg3: memref<32x2xf32, #tpu.memory_space<vmem>>, %arg4: memref<32x256xbf16, #tpu.memory_space<vmem>>, %arg5: memref<896x128xbf16, #tpu.memory_space<vmem>>, %arg6: memref<256x128xbf16, #tpu.memory_space<vmem>>, %arg7: memref<1x128xf32, #tpu.memory_space<vmem>>, %arg8: memref<128x896xbf16, #tpu.memory_space<vmem>>, %arg9: memref<1x896xf32, #tpu.memory_space<vmem>>, %arg10: memref<1x1xf32, #tpu.memory_space<vmem>>) attributes {dimension_semantics = [#tpu.dimension_semantics<arbitrary>], iteration_bounds = array<i64: 1>, scalar_prefetch = 0 : i64, scratch_operands = 0 : i64, tpu.core_type = #tpu.core_type<tc>, window_params = [{transform_indices = @transform_0, window_bounds = array<i64: 32, 896>}, {transform_indices = @transform_1, window_bounds = array<i64: 32, 896>}, {transform_indices = @transform_2, window_bounds = array<i64: 32, 2>}, {transform_indices = @transform_3, window_bounds = array<i64: 32, 256>}, {pipeline_mode = #tpu.pipeline_mode<synchronous>, transform_indices = @transform_4, window_bounds = array<i64: 896, 128>}, {pipeline_mode = #tpu.pipeline_mode<synchronous>, transform_indices = @transform_5, window_bounds = array<i64: 256, 128>}, {pipeline_mode = #tpu.pipeline_mode<synchronous>, transform_indices = @transform_6, window_bounds = array<i64: 1, 128>}, {pipeline_mode = #tpu.pipeline_mode<synchronous>, transform_indices = @transform_7, window_bounds = array<i64: 128, 896>}, {pipeline_mode = #tpu.pipeline_mode<synchronous>, transform_indices = @transform_8, window_bounds = array<i64: 1, 896>}, {pipeline_mode = #tpu.pipeline_mode<synchronous>, transform_indices = @transform_9, window_bounds = array<i64: 1, 1>}]} {
    %c0_i32 = arith.constant 0 : i32
    %0 = arith.cmpi eq, %arg0, %c0_i32 : i32
    %1 = arith.extui %0 : i1 to i32
    %c0_i32_0 = arith.constant 0 : i32
    %2 = arith.cmpi ne, %1, %c0_i32_0 : i32
    scf.if %2 {
      %cst_29 = arith.constant 0.000000e+00 : f32
      %53 = vector.broadcast %cst_29 : f32 to vector<1x1xf32>
      %c0_30 = arith.constant 0 : index
      %c0_31 = arith.constant 0 : index
      %54 = vector.load %arg10[%c0_30, %c0_31] : memref<1x1xf32, #tpu.memory_space<vmem>>, vector<1x1xf32>
      tpu.vector_store %arg10[%c0_30, %c0_31], %53 {strides = array<i32>} : memref<1x1xf32, #tpu.memory_space<vmem>>, vector<1x1xf32>,
    } else {
    }
    %c0 = arith.constant 0 : index
    %c0_1 = arith.constant 0 : index
    %3 = vector.load %arg1[%c0, %c0_1] : memref<32x896xf32, #tpu.memory_space<vmem>>, vector<32x896xf32>
    %c0_2 = arith.constant 0 : index
    %c0_3 = arith.constant 0 : index
    %4 = vector.load %arg2[%c0_2, %c0_3] : memref<32x896xf32, #tpu.memory_space<vmem>>, vector<32x896xf32>
    %c0_4 = arith.constant 0 : index
    %c0_5 = arith.constant 0 : index
    %5 = vector.load %arg3[%c0_4, %c0_5] : memref<32x2xf32, #tpu.memory_space<vmem>>, vector<32x1xf32>
    %c0_6 = arith.constant 0 : index
    %c1 = arith.constant 1 : index
    %6 = vector.load %arg3[%c0_6, %c1] : memref<32x2xf32, #tpu.memory_space<vmem>>, vector<32x1xf32>
    %7 = vector.broadcast %5 : vector<32x1xf32> to vector<32x896xf32>
    %8 = arith.mulf %7, %3 : vector<32x896xf32>
    %9 = vector.broadcast %6 : vector<32x1xf32> to vector<32x896xf32>
    %10 = arith.mulf %9, %4 : vector<32x896xf32>
    %11 = arith.addf %8, %10 : vector<32x896xf32>
    %12 = arith.truncf %11 : vector<32x896xf32> to vector<32x896xbf16>
    %c0_7 = arith.constant 0 : index
    %c0_8 = arith.constant 0 : index
    %13 = vector.load %arg5[%c0_7, %c0_8] : memref<896x128xbf16, #tpu.memory_space<vmem>>, vector<896x128xbf16>
    %cst = arith.constant dense<0.000000e+00> : vector<32x128xf32>
    %14 = tpu.matmul %12, %13, %cst {dimension_numbers = #tpu.dot_dimension_numbers<[1], [0], [0], [1], [0, 0, 1, 1], [], []>} : vector<32x896xbf16>, vector<896x128xbf16>, vector<32x128xf32> -> vector<32x128xf32>
    %c0_9 = arith.constant 0 : index
    %c0_10 = arith.constant 0 : index
    %15 = vector.load %arg4[%c0_9, %c0_10] : memref<32x256xbf16, #tpu.memory_space<vmem>>, vector<32x256xbf16>
    %c0_11 = arith.constant 0 : index
    %c0_12 = arith.constant 0 : index
    %16 = vector.load %arg6[%c0_11, %c0_12] : memref<256x128xbf16, #tpu.memory_space<vmem>>, vector<256x128xbf16>
    %cst_13 = arith.constant dense<0.000000e+00> : vector<32x128xf32>
    %17 = tpu.matmul %15, %16, %cst_13 {dimension_numbers = #tpu.dot_dimension_numbers<[1], [0], [0], [1], [0, 0, 1, 1], [], []>} : vector<32x256xbf16>, vector<256x128xbf16>, vector<32x128xf32> -> vector<32x128xf32>
    %18 = arith.addf %14, %17 : vector<32x128xf32>
    %c0_14 = arith.constant 0 : index
    %c0_15 = arith.constant 0 : index
    %19 = vector.load %arg7[%c0_14, %c0_15] : memref<1x128xf32, #tpu.memory_space<vmem>>, vector<1x128xf32>
    %20 = vector.broadcast %19 : vector<1x128xf32> to vector<32x128xf32>
    %21 = arith.addf %18, %20 : vector<32x128xf32>
    %cst_16 = arith.constant 0.000000e+00 : f32
    %22 = vector.broadcast %cst_16 : f32 to vector<32x128xf32>
    %23 = arith.maximumf %21, %22 : vector<32x128xf32>
    %24 = arith.truncf %23 : vector<32x128xf32> to vector<32x128xbf16>
    %c0_17 = arith.constant 0 : index
    %c0_18 = arith.constant 0 : index
    %25 = vector.load %arg8[%c0_17, %c0_18] : memref<128x896xbf16, #tpu.memory_space<vmem>>, vector<128x896xbf16>
    %cst_19 = arith.constant dense<0.000000e+00> : vector<32x896xf32>
    %26 = tpu.matmul %24, %25, %cst_19 {dimension_numbers = #tpu.dot_dimension_numbers<[1], [0], [0], [1], [0, 0, 1, 1], [], []>} : vector<32x128xbf16>, vector<128x896xbf16>, vector<32x896xf32> -> vector<32x896xf32>
    %c0_20 = arith.constant 0 : index
    %c0_21 = arith.constant 0 : index
    %27 = vector.load %arg9[%c0_20, %c0_21] : memref<1x896xf32, #tpu.memory_space<vmem>>, vector<1x896xf32>
    %28 = vector.broadcast %27 : vector<1x896xf32> to vector<32x896xf32>
    %29 = arith.addf %26, %28 : vector<32x896xf32>
    %c32_i32 = arith.constant 32 : i32
    %30 = arith.muli %arg0, %c32_i32 : i32
    %31 = tpu.iota {dimensions = array<i32: 0>} : vector<32x1xi32>
    %32 = vector.broadcast %30 : i32 to vector<32x1xi32>
    %33 = arith.addi %32, %31 : vector<32x1xi32>
    %c2_i32 = arith.constant 2 : i32
    %34 = vector.broadcast %c2_i32 : i32 to vector<32x1xi32>
    %35 = arith.cmpi slt, %33, %34 : vector<32x1xi32>
    %36 = arith.extui %35 : vector<32x1xi1> to vector<32x1xi32>
    %37 = arith.sitofp %36 : vector<32x1xi32> to vector<32x1xf32>
    %38 = arith.subf %29, %4 : vector<32x896xf32>
    %39 = vector.broadcast %37 : vector<32x1xf32> to vector<32x896xf32>
    %40 = arith.mulf %38, %39 : vector<32x896xf32>
    %c0_22 = arith.constant 0 : index
    %c0_23 = arith.constant 0 : index
    %41 = vector.load %arg10[%c0_22, %c0_23] : memref<1x1xf32, #tpu.memory_space<vmem>>, vector<1x1xf32>
    %42 = arith.mulf %40, %40 : vector<32x896xf32>
    %43 = vector.shape_cast %42 : vector<32x896xf32> to vector<1x32x896xf32>
    %cst_24 = arith.constant dense<0.000000e+00> : vector<1xf32>
    %44 = vector.multi_reduction <add>, %43, %cst_24 [1, 2] : vector<1x32x896xf32> to vector<1xf32>
    %45 = vector.shape_cast %44 : vector<1xf32> to vector<1x1x1xf32>
    %46 = vector.extract %45[0, 0, 0] : f32 from vector<1x1x1xf32>
    %47 = vector.broadcast %46 : f32 to vector<1x1xf32>
    %48 = arith.addf %41, %47 : vector<1x1xf32>
    %c0_25 = arith.constant 0 : index
    %c0_26 = arith.constant 0 : index
    %49 = vector.load %arg10[%c0_25, %c0_26] : memref<1x1xf32, #tpu.memory_space<vmem>>, vector<1x1xf32>
    tpu.vector_store %arg10[%c0_25, %c0_26], %48 {strides = array<i32>} : memref<1x1xf32, #tpu.memory_space<vmem>>, vector<1x1xf32>,
    %c0_i32_27 = arith.constant 0 : i32
    %50 = arith.cmpi eq, %arg0, %c0_i32_27 : i32
    %51 = arith.extui %50 : i1 to i32
    %c0_i32_28 = arith.constant 0 : i32
    %52 = arith.cmpi ne, %51, %c0_i32_28 : i32
    scf.if %52 {
      %c0_29 = arith.constant 0 : index
      %c0_30 = arith.constant 0 : index
      %53 = vector.load %arg10[%c0_29, %c0_30] : memref<1x1xf32, #tpu.memory_space<vmem>>, vector<1x1xf32>
      %cst_31 = arith.constant 6.37755089E-4 : f32
      %54 = vector.broadcast %cst_31 : f32 to vector<1x1xf32>
      %55 = arith.mulf %53, %54 : vector<1x1xf32>
      %c0_32 = arith.constant 0 : index
      %c0_33 = arith.constant 0 : index
      %56 = vector.load %arg10[%c0_32, %c0_33] : memref<1x1xf32, #tpu.memory_space<vmem>>, vector<1x1xf32>
      tpu.vector_store %arg10[%c0_32, %c0_33], %55 {strides = array<i32>} : memref<1x1xf32, #tpu.memory_space<vmem>>, vector<1x1xf32>,
    } else {
    }
    return
  }
  func.func @transform_0(%arg0: i32) -> (i32, i32) {
    %c0_i32 = arith.constant 0 : i32
    %c0_i32_0 = arith.constant 0 : i32
    return %arg0, %c0_i32 : i32, i32
  }
  func.func @transform_1(%arg0: i32) -> (i32, i32) {
    %c0_i32 = arith.constant 0 : i32
    %c0_i32_0 = arith.constant 0 : i32
    return %arg0, %c0_i32 : i32, i32
  }
  func.func @transform_2(%arg0: i32) -> (i32, i32) {
    %c0_i32 = arith.constant 0 : i32
    %c0_i32_0 = arith.constant 0 : i32
    return %arg0, %c0_i32 : i32, i32
  }
  func.func @transform_3(%arg0: i32) -> (i32, i32) {
    %c0_i32 = arith.constant 0 : i32
    %c0_i32_0 = arith.constant 0 : i32
    return %arg0, %c0_i32 : i32, i32
  }
  func.func @transform_4(%arg0: i32) -> (i32, i32) {
    %c0_i32 = arith.constant 0 : i32
    %c0_i32_0 = arith.constant 0 : i32
    %c0_i32_1 = arith.constant 0 : i32
    return %c0_i32, %c0_i32_0 : i32, i32
  }
  func.func @transform_5(%arg0: i32) -> (i32, i32) {
    %c0_i32 = arith.constant 0 : i32
    %c0_i32_0 = arith.constant 0 : i32
    %c0_i32_1 = arith.constant 0 : i32
    return %c0_i32, %c0_i32_0 : i32, i32
  }
  func.func @transform_6(%arg0: i32) -> (i32, i32) {
    %c0_i32 = arith.constant 0 : i32
    %c0_i32_0 = arith.constant 0 : i32
    %c0_i32_1 = arith.constant 0 : i32
    return %c0_i32, %c0_i32_0 : i32, i32
  }
  func.func @transform_7(%arg0: i32) -> (i32, i32) {
    %c0_i32 = arith.constant 0 : i32
    %c0_i32_0 = arith.constant 0 : i32
    %c0_i32_1 = arith.constant 0 : i32
    return %c0_i32, %c0_i32_0 : i32, i32
  }
  func.func @transform_8(%arg0: i32) -> (i32, i32) {
    %c0_i32 = arith.constant 0 : i32
    %c0_i32_0 = arith.constant 0 : i32
    %c0_i32_1 = arith.constant 0 : i32
    return %c0_i32, %c0_i32_0 : i32, i32
  }
  func.func @transform_9(%arg0: i32) -> (i32, i32) {
    %c0_i32 = arith.constant 0 : i32
    %c0_i32_0 = arith.constant 0 : i32
    %c0_i32_1 = arith.constant 0 : i32
    return %c0_i32, %c0_i32_0 : i32, i32
  }
}

</mosaic_0001>

<bundles_post_ra>
// kernel: diffusion_model_forward.1
= control target key start
LH: loop header
LB: loop body
LE: loop exit
PB: predicated region body
PF: predicated region fallthrough
CT: control target
= control target key end

     0   :  { %v2403_v1 = vmov 1   ;;  %v2404_v2 = vmov 0   ;;  %s3521_s0 = inlined_call_operand.vmem [shape: f32[32,896], index: 0, kind: input, shape index: {}]   ;;  %s3522_s1 = inlined_call_operand.vmem [shape: f32[32,896], index: 1, kind: input, shape index: {}]   ;;  %s3523_s2 = inlined_call_operand.vmem [shape: f32[32,2], index: 2, kind: input, shape index: {}]   ;;  %s3524_s3 = inlined_call_operand.vmem [shape: bf16[32,256], index: 3, kind: input, shape index: {}]   ;;  %s3525_s4 = inlined_call_operand.vmem [shape: bf16[896,128], index: 4, kind: input, shape index: {}]   ;;  %s3526_s5 = inlined_call_operand.vmem [shape: bf16[256,128], index: 5, kind: input, shape index: {}]   ;;  %s3527_s6 = inlined_call_operand.vmem [shape: f32[1,128], index: 6, kind: input, shape index: {}]   ;;  %s3528_s7 = inlined_call_operand.vmem [shape: bf16[128,896], index: 7, kind: input, shape index: {}]   ;;  %s3529_s8 = inlined_call_operand.vmem [shape: f32[1,896], index: 8, kind: input, shape index: {}]   ;;  %s3530_s9 = inlined_call_operand.hbm [shape: f32[1,1], index: 9, kind: output, shape index: {}]  }
   0x1   :  { %v95_v0 = vld [vmem:[%s3523_s2] sm:$0xff]  ;;  %2357 = vset.pattern.permute.xlu1 %v2403_v1  ;;  %2356 = vset.pattern.permute.xlu0 %v2404_v2  ;;  %v2285_v3 = vld [vmem:[%s3526_s5 + $0x38] sm:$0xff]  ;;  %v97_v5 = vld [vmem:[%s3523_s2 + $0x10] sm:$0xff] }
   0x2   :  { %v2293_v4 = vld [vmem:[%s3526_s5 + $0x78] sm:$0xff]  ;;  %148 = vperm.xlu1 %2357, %v95_v0   ;;  %101 = vperm.xlu0 %2356, %v95_v0   ;;  %v2284_v6 = vld [vmem:[%s3526_s5 + $0x30] sm:$0xff]  ;;  %v96_v8 = vld [vmem:[%s3523_s2 + $0x8] sm:$0xff] }
   0x3   :  { %2358 = vset.pattern.permute.xlu2 %v2404_v2  ;;  %497 = vmatpush.bf16.msra.mxu0 %v2285_v3  ;;  %v2292_v7 = vld [vmem:[%s3526_s5 + $0x70] sm:$0xff]  ;;  %v2283_v9 = vld [vmem:[%s3526_s5 + $0x28] sm:$0xff]  ;;  %v2225_v11 = vld [vmem:[%s3525_s4 + $0x38] sm:$0xff] }
   0x4   :  { %111 = vperm.xlu2 %2358, %v97_v5   ;;  %516 = vmatpush.bf16.msra.mxu1 %v2293_v4  ;;  %v2291_v10 = vld [vmem:[%s3526_s5 + $0x68] sm:$0xff]  ;;  %v2233_v12 = vld [vmem:[%s3525_s4 + $0x78] sm:$0xff]  ;;  %v2282_v14 = vld [vmem:[%s3526_s5 + $0x20] sm:$0xff] }
   0x5   :  { %v98_v13 = vld [vmem:[%s3523_s2 + $0x18] sm:$0xff]  ;;  %871 = vmatpush.bf16.msra.mxu2 %v2225_v11  ;;  %v2224_v15 = vld [vmem:[%s3525_s4 + $0x30] sm:$0xff]  ;;  %v2290_v16 = vld [vmem:[%s3526_s5 + $0x60] sm:$0xff]  ;;  %890 = vmatpush.bf16.msra.mxu3 %v2233_v12 }
   0x6   :  { %v2232_v17 = vld [vmem:[%s3525_s4 + $0x70] sm:$0xff] }
   0x7   :  { %498 = vmatpush.bf16.msra.mxu0 %v2284_v6 }
   0x8   :  { %517 = vmatpush.bf16.msra.mxu1 %v2292_v7 }
   0xa   :  { %152 = vperm.xlu1 %2357, %v96_v8   ;;  %106 = vperm.xlu0 %2356, %v96_v8  }
   0xb   :  { %499 = vmatpush.bf16.msra.mxu0 %v2283_v9 }
   0xc   :  { %116 = vperm.xlu2 %2358, %v98_v13   ;;  %518 = vmatpush.bf16.msra.mxu1 %v2291_v10 }
   0xd   :  { %14 = vsyncpa [#allocation3], 0  ;;  %v2281_v18 = vld [vmem:[%s3526_s5 + $0x18] sm:$0xff]  ;;  %872 = vmatpush.bf16.msra.mxu2 %v2224_v15  ;;  %v2223_v20 = vld [vmem:[%s3525_s4 + $0x28] sm:$0xff]  ;;  %891 = vmatpush.bf16.msra.mxu3 %v2232_v17  ;;  %vm37_vm1 = vcmask 0   ;;  %s2406_s20 = smov [#allocation2]  }
   0xe   :  { %v2289_v19 = vld [vmem:[%s3526_s5 + $0x58] sm:$0xff]  ;;  %v2231_v21 = vld [vmem:[%s3525_s4 + $0x68] sm:$0xff]  ;;  %v2280_v22 = vld [vmem:[%s3526_s5 + $0x10] sm:$0xff]  ;;  %s1678_s21 = sshll.u32 %s2406_s20, 4  ;;  %s1680_s24 = sshll.u32 %s3530_s9, 4  ;;  %s1679_s21 = int_to_ptr.vmem [resolvable:$true] %s1678_s21  ;;  %s1681_s24 = int_to_ptr.hbm [resolvable:$true] %s1680_s24 }
   0xf   :  { %500 = vmatpush.bf16.msra.mxu0 %v2282_v14  ;;  %v2288_v23 = vld [vmem:[%s3526_s5 + $0x50] sm:$0xff]  ;;  %v2222_v24 = vld [vmem:[%s3525_s4 + $0x20] sm:$0xff]  ;;  %v2279_v26 = vld [vmem:[%s3526_s5 + $0x8] sm:$0xff] }
  0x10   :  { %519 = vmatpush.bf16.msra.mxu1 %v2290_v16  ;;  %v2230_v25 = vld [vmem:[%s3525_s4 + $0x60] sm:$0xff]  ;;  %v2287_v27 = vld [vmem:[%s3526_s5 + $0x48] sm:$0xff]  ;;  %v2221_v28 = vld [vmem:[%s3525_s4 + $0x18] sm:$0xff] }
  0x11   :  { %873 = vmatpush.bf16.msra.mxu2 %v2223_v20  ;;  %892 = vmatpush.bf16.msra.mxu3 %v2231_v21  ;;  %v2229_v29 = vld [vmem:[%s3525_s4 + $0x58] sm:$0xff]  ;;  %v2278_v30 = vld [vmem:[%s3526_s5] sm:$0xff]  ;;  %v2275_v33 = vld [vmem:[%s3524_s3 + $0x4] sm:$0xf0] }
  0x12   :  { %160 = vperm.xlu1 %2357, %v98_v13   ;;  %2359 = vset.pattern.permute.xlu0 %v2403_v1  ;;  %v2286_v31 = vld [vmem:[%s3526_s5 + $0x40] sm:$0xff]  ;;  %v1693_v35 = vld [vmem:[%s3524_s3 + $0x8] sm:$0xf0]  ;;  %v2241_v36 = vld [vmem:[%s3525_s4 + $0xb8] sm:$0xff] }
  0x13   :  { %156 = vperm.xlu0 %2359, %v97_v5   ;;  %501 = vmatpush.bf16.msra.mxu0 %v2281_v18  ;;  %v1691_v32 = vld [vmem:[%s3524_s3] sm:$0xf]  ;;  %v2274_v34 = vld [vmem:[%s3524_s3 + $0x4] sm:$0xf]  ;;  %v2249_v37 = vld [vmem:[%s3525_s4 + $0xf8] sm:$0xff] }
  0x14   :  { %520 = vmatpush.bf16.msra.mxu1 %v2289_v19  ;;  %v1692_v38 = vor.u32 %v2275_v33, %v1691_v32  ;;  %v1696_v39 = vor.u32 %v2274_v34, %v1693_v35  ;;  %v2240_v40 = vld [vmem:[%s3525_s4 + $0xb0] sm:$0xff]  ;;  %v2239_v42 = vld [vmem:[%s3525_s4 + $0xa8] sm:$0xff]  ;;  %v2238_v44 = vld [vmem:[%s3525_s4 + $0xa0] sm:$0xff] }
  0x15   :  { %874 = vmatpush.bf16.msra.mxu2 %v2222_v24  ;;  %893 = vmatpush.bf16.msra.mxu3 %v2230_v25  ;;  %v2248_v41 = vld [vmem:[%s3525_s4 + $0xf0] sm:$0xff]  ;;  %v2247_v43 = vld [vmem:[%s3525_s4 + $0xe8] sm:$0xff]  ;;  %v2246_v45 = vld [vmem:[%s3525_s4 + $0xe0] sm:$0xff] }
  0x16   :  { %v1699_v46 = vld [vmem:[%s3524_s3 + $0x10] sm:$0xf]  ;;  %v2277_v47 = vld [vmem:[%s3524_s3 + $0x14] sm:$0xf0]  ;;  %v2276_v48 = vld [vmem:[%s3524_s3 + $0x14] sm:$0xf] }
  0x17   :  { %502 = vmatpush.bf16.msra.mxu0 %v2280_v22  ;;  %v1701_v49 = vld [vmem:[%s3524_s3 + $0x18] sm:$0xf0]  ;;  %v1700_v52 = vor.u32 %v2277_v47, %v1699_v46  ;;  %v2220_v54 = vld [vmem:[%s3525_s4 + $0x10] sm:$0xff]  ;;  %v2219_v58 = vld [vmem:[%s3525_s4 + $0x8] sm:$0xff] }
  0x18   :  { %521 = vmatpush.bf16.msra.mxu1 %v2288_v23  ;;  %v2237_v50 = vld [vmem:[%s3525_s4 + $0x98] sm:$0xff]  ;;  %v1704_v53 = vor.u32 %v2276_v48, %v1701_v49  ;;  %v2228_v55 = vld [vmem:[%s3525_s4 + $0x50] sm:$0xff]  ;;  %v2227_v59 = vld [vmem:[%s3525_s4 + $0x48] sm:$0xff] }
  0x19   :  { %875 = vmatpush.bf16.msra.mxu2 %v2221_v28  ;;  %894 = vmatpush.bf16.msra.mxu3 %v2229_v29  ;;  %v2245_v51 = vld [vmem:[%s3525_s4 + $0xd8] sm:$0xff]  ;;  %v2236_v56 = vld [vmem:[%s3525_s4 + $0x90] sm:$0xff]  ;;  %v2235_v60 = vld [vmem:[%s3525_s4 + $0x88] sm:$0xff] }
  0x1a   :  { %v2244_v57 = vld [vmem:[%s3525_s4 + $0xd0] sm:$0xff]  ;;  %v2243_v61 = vld [vmem:[%s3525_s4 + $0xc8] sm:$0xff]  ;;  %v2218_v62 = vld [vmem:[%s3525_s4] sm:$0xff] }
  0x1b   :  { %503 = vmatpush.bf16.msra.mxu0 %v2279_v26  ;;  %v2226_v63 = vld [vmem:[%s3525_s4 + $0x40] sm:$0xff]  ;;  %v2257_v2 = vld [vmem:[%s3525_s4 + $0x138] sm:$0xff]  ;;  %v2256_v5 = vld [vmem:[%s3525_s4 + $0x130] sm:$0xff] }
  0x1c   :  { %522 = vmatpush.bf16.msra.mxu1 %v2287_v27  ;;  %v2234_v0 = vld [vmem:[%s3525_s4 + $0x80] sm:$0xff]  ;;  %v2265_v3 = vld [vmem:[%s3525_s4 + $0x178] sm:$0xff]  ;;  %v2264_v6 = vld [vmem:[%s3525_s4 + $0x170] sm:$0xff] }
  0x1d   :  { %876 = vmatpush.bf16.msra.mxu2 %v2220_v54  ;;  %895 = vmatpush.bf16.msra.mxu3 %v2228_v55  ;;  %v2242_v1 = vld [vmem:[%s3525_s4 + $0xc0] sm:$0xff]  ;;  %v2273_v4 = vld [vmem:[%s3525_s4 + $0x1b8] sm:$0xff]  ;;  %v2272_v7 = vld [vmem:[%s3525_s4 + $0x1b0] sm:$0xff] }
  0x1e   :  { %v2255_v8 = vld [vmem:[%s3525_s4 + $0x128] sm:$0xff]  ;;  %v2254_v11 = vld [vmem:[%s3525_s4 + $0x120] sm:$0xff]  ;;  %v2253_v14 = vld [vmem:[%s3525_s4 + $0x118] sm:$0xff] }
  0x1f   :  { %504 = vmatpush.bf16.msra.mxu0 %v2278_v30  ;;  %v2263_v9 = vld [vmem:[%s3525_s4 + $0x168] sm:$0xff]  ;;  %v2262_v12 = vld [vmem:[%s3525_s4 + $0x160] sm:$0xff]  ;;  %v2261_v15 = vld [vmem:[%s3525_s4 + $0x158] sm:$0xff] }
  0x20   :  { %523 = vmatpush.bf16.msra.mxu1 %v2286_v31  ;;  %v2271_v10 = vld [vmem:[%s3525_s4 + $0x1a8] sm:$0xff]  ;;  %v2270_v13 = vld [vmem:[%s3525_s4 + $0x1a0] sm:$0xff]  ;;  %v2269_v16 = vld [vmem:[%s3525_s4 + $0x198] sm:$0xff] }
  0x21   :  { %877 = vmatpush.bf16.msra.mxu2 %v2219_v58  ;;  %896 = vmatpush.bf16.msra.mxu3 %v2227_v59  ;;  %v2252_v19 = vld [vmem:[%s3525_s4 + $0x110] sm:$0xff]  ;;  %v39_v20 = vld [vmem:[%s3521_s0] sm:$0xff]  ;;  %v40_v22 = vld [vmem:[%s3521_s0 + $0x8] sm:$0xff] }
  0x22   :  { %505 = vmatmul.bf16.vlgmr.msra.gmra.mxu0 %v1692_v38  ;;  %v67_v21 = vld [vmem:[%s3522_s1] sm:$0xff]  ;;  %v68_v23 = vld [vmem:[%s3522_s1 + $0x8] sm:$0xff]  ;;  %v2260_v24 = vld [vmem:[%s3525_s4 + $0x150] sm:$0xff] }
  0x23   :  { %909 = vmatpush.bf16.msrb.mxu0 %v2241_v36  ;;  %524 = vmatmul.bf16.vlgmr.msra.gmra.mxu1 %v1696_v39  ;;  %v41_v25 = vld [vmem:[%s3521_s0 + $0x10] sm:$0xff]  ;;  %v42_v27 = vld [vmem:[%s3521_s0 + $0x18] sm:$0xff]  ;;  %v47_v32 = vld [vmem:[%s3521_s0 + $0x40] sm:$0xff] }
  0x24   :  { %928 = vmatpush.bf16.msrb.mxu1 %v2249_v37  ;;  %v69_v26 = vld [vmem:[%s3522_s1 + $0x10] sm:$0xff]  ;;  %v46_v29 = vld [vmem:[%s3521_s0 + $0x38] sm:$0xff]  ;;  %v75_v33 = vld [vmem:[%s3522_s1 + $0x40] sm:$0xff] }
  0x25   :  { %878 = vmatpush.bf16.msra.mxu2 %v2218_v62  ;;  %897 = vmatpush.bf16.msra.mxu3 %v2226_v63  ;;  %v2268_v28 = vld [vmem:[%s3525_s4 + $0x190] sm:$0xff]  ;;  %v74_v30 = vld [vmem:[%s3522_s1 + $0x38] sm:$0xff]  ;;  %v2251_v34 = vld [vmem:[%s3525_s4 + $0x108] sm:$0xff] }
  0x26   :  { %v70_v31 = vld [vmem:[%s3522_s1 + $0x18] sm:$0xff]  ;;  %v48_v36 = vld [vmem:[%s3521_s0 + $0x48] sm:$0xff] }
  0x27   :  { %910 = vmatpush.bf16.msrb.mxu0 %v2240_v40  ;;  %v76_v37 = vld [vmem:[%s3522_s1 + $0x48] sm:$0xff] }
  0x28   :  { %929 = vmatpush.bf16.msrb.mxu1 %v2248_v41  ;;  %v2259_v38 = vld [vmem:[%s3525_s4 + $0x148] sm:$0xff] }
  0x29   :  { %947 = vmatpush.bf16.msrb.mxu2 %v2257_v2  ;;  %966 = vmatpush.bf16.msrb.mxu3 %v2265_v3 }
  0x2b   :  { %911 = vmatpush.bf16.msrb.mxu0 %v2239_v42 }
  0x2c   :  { %930 = vmatpush.bf16.msrb.mxu1 %v2247_v43  ;;  %v49_v43 = vld [vmem:[%s3521_s0 + $0x50] sm:$0xff] }
  0x2d   :  { %948 = vmatpush.bf16.msrb.mxu2 %v2256_v5  ;;  %967 = vmatpush.bf16.msrb.mxu3 %v2264_v6 }
  0x2f   :  { %912 = vmatpush.bf16.msrb.mxu0 %v2238_v44  ;;  %v77_v44 = vld [vmem:[%s3522_s1 + $0x50] sm:$0xff] }
  0x30   :  { %931 = vmatpush.bf16.msrb.mxu1 %v2246_v45  ;;  %v2267_v45 = vld [vmem:[%s3525_s4 + $0x188] sm:$0xff] }
  0x31   :  { %949 = vmatpush.bf16.msrb.mxu2 %v2255_v8  ;;  %968 = vmatpush.bf16.msrb.mxu3 %v2263_v9  ;;  %v2266_v8 = vld [vmem:[%s3525_s4 + $0x180] sm:$0xff] }
  0x32   :  { %510 = vmatmul.bf16.gmra.mxu0 %v1700_v52 }
  0x33   :  { %913 = vmatpush.bf16.msrb.mxu0 %v2237_v50  ;;  %529 = vmatmul.bf16.gmra.mxu1 %v1704_v53 }
  0x34   :  { %932 = vmatpush.bf16.msrb.mxu1 %v2245_v51 }
  0x35   :  { %950 = vmatpush.bf16.msrb.mxu2 %v2254_v11  ;;  %969 = vmatpush.bf16.msrb.mxu3 %v2262_v12  ;;  %v53_v11 = vld [vmem:[%s3521_s0 + $0x70] sm:$0xff]  ;;  %v60_v12 = vld [vmem:[%s3521_s0 + $0xa8] sm:$0xff] }
  0x37   :  { %914 = vmatpush.bf16.msrb.mxu0 %v2236_v56  ;;  %v2250_v56 = vld [vmem:[%s3525_s4 + $0x100] sm:$0xff] }
  0x38   :  { %933 = vmatpush.bf16.msrb.mxu1 %v2244_v57 }
  0x39   :  { %951 = vmatpush.bf16.msrb.mxu2 %v2253_v14  ;;  %970 = vmatpush.bf16.msrb.mxu3 %v2261_v15  ;;  %v81_v14 = vld [vmem:[%s3522_s1 + $0x70] sm:$0xff]  ;;  %v88_v15 = vld [vmem:[%s3522_s1 + $0xa8] sm:$0xff] }
  0x3b   :  { %915 = vmatpush.bf16.msrb.mxu0 %v2235_v60 }
  0x3c   :  { %934 = vmatpush.bf16.msrb.mxu1 %v2243_v61  ;;  %v2258_v61 = vld [vmem:[%s3525_s4 + $0x140] sm:$0xff] }
  0x3d   :  { %952 = vmatpush.bf16.msrb.mxu2 %v2252_v19  ;;  %971 = vmatpush.bf16.msrb.mxu3 %v2260_v24  ;;  %v61_v19 = vld [vmem:[%s3521_s0 + $0xb0] sm:$0xff] }
  0x3f   :  { %916 = vmatpush.bf16.msrb.mxu0 %v2234_v0 }
  0x40   :  { %935 = vmatpush.bf16.msrb.mxu1 %v2242_v1 }
  0x41   :  { %953 = vmatpush.bf16.msrb.mxu2 %v2251_v34  ;;  %972 = vmatpush.bf16.msrb.mxu3 %v2259_v38  ;;  %v84_v34 = vld [vmem:[%s3522_s1 + $0x88] sm:$0xff] }
  0x43   :  { %985 = vmatpush.bf16.msra.mxu0 %v2273_v4 }
  0x45   :  { %954 = vmatpush.bf16.msrb.mxu2 %v2250_v56  ;;  %973 = vmatpush.bf16.msrb.mxu3 %v2258_v61 }
  0x47   :  { %986 = vmatpush.bf16.msra.mxu0 %v2272_v7 }
  0x4b   :  { %987 = vmatpush.bf16.msra.mxu0 %v2271_v10 }
  0x4f   :  { %988 = vmatpush.bf16.msra.mxu0 %v2270_v13 }
  0x53   :  { %989 = vmatpush.bf16.msra.mxu0 %v2269_v16  ;;  %v54_v16 = vld [vmem:[%s3521_s0 + $0x78] sm:$0xff] }
  0x57   :  { %990 = vmatpush.bf16.msra.mxu0 %v2268_v28  ;;  %v83_v28 = vld [vmem:[%s3522_s1 + $0x80] sm:$0xff] }
  0x5b   :  { %991 = vmatpush.bf16.msra.mxu0 %v2267_v45 }
  0x5e   :  { %v2734_v35 = vpop.permute.xlu2 %111 }
  0x5f   :  { %992 = vmatpush.bf16.msra.mxu0 %v2266_v8  ;;  %v2891_v8 = vld [vmem:[%s3522_s1 + $0x28] sm:$0xff] }
  0x66   :  { %v2789_v13 = vpop.permute.xlu2 %116 }
  0x74   :  { %v2682_v17 = vpop.permute.xlu1 %148  ;;  %v2684_v18 = vpop.permute.xlu0 %101 }
  0x75   :  { %v119_v39 = vmul.f32 %v2684_v18, %v39_v20  ;;  %v163_v40 = vmul.f32 %v2682_v17, %v67_v21  ;;  %v120_v41 = vmul.f32 %v2684_v18, %v40_v22  ;;  %v164_v42 = vmul.f32 %v2682_v17, %v68_v23  ;;  %v55_v20 = vld [vmem:[%s3521_s0 + $0x80] sm:$0xff]  ;;  %v62_v21 = vld [vmem:[%s3521_s0 + $0xb8] sm:$0xff]  ;;  %v56_v22 = vld [vmem:[%s3521_s0 + $0x88] sm:$0xff] }
  0x76   :  { %v121_v48 = vmul.f32 %v2684_v18, %v41_v25  ;;  %v165_v49 = vmul.f32 %v2682_v17, %v69_v26  ;;  %v122_v50 = vmul.f32 %v2684_v18, %v42_v27  ;;  %v166_v51 = vmul.f32 %v2682_v17, %v70_v31  ;;  %v63_v23 = vld [vmem:[%s3521_s0 + $0xc0] sm:$0xff]  ;;  %v82_v26 = vld [vmem:[%s3522_s1 + $0x78] sm:$0xff]  ;;  %v89_v27 = vld [vmem:[%s3522_s1 + $0xb0] sm:$0xff] }
  0x77   :  { %v191_v62 = vadd.f32 %v163_v40, %v119_v39  ;;  %v192_v0 = vadd.f32 %v164_v42, %v120_v41  ;;  %v134_v31 = vmul.f32 %v2734_v35, %v54_v16  ;;  %v142_v38 = vmul.f32 %v2789_v13, %v62_v21 }
  0x78   :  { %v193_v2 = vadd.f32 %v165_v49, %v121_v48  ;;  %v194_v4 = vadd.f32 %v166_v51, %v122_v50  ;;  %v136_v39 = vmul.f32 %v2734_v35, %v56_v22  ;;  %v143_v40 = vmul.f32 %v2789_v13, %v63_v23 }
  0x79   :  { %v168_v23 = vmul.f32 %v2682_v17, %v2891_v8 }
  0x7c   :  { %v2758_v46 = vpop.permute.xlu1 %152  ;;  %v2760_v47 = vpop.permute.xlu0 %106 }
  0x7d   :  { %v126_v52 = vmul.f32 %v2760_v47, %v46_v29  ;;  %v170_v53 = vmul.f32 %v2758_v46, %v74_v30  ;;  %v127_v54 = vmul.f32 %v2760_v47, %v47_v32  ;;  %v171_v55 = vmul.f32 %v2758_v46, %v75_v33  ;;  %v90_v33 = vld [vmem:[%s3522_s1 + $0xb8] sm:$0xff] }
  0x7e   :  { %v128_v57 = vmul.f32 %v2760_v47, %v48_v36  ;;  %v172_v58 = vmul.f32 %v2758_v46, %v76_v37  ;;  %v129_v59 = vmul.f32 %v2760_v47, %v49_v43  ;;  %v173_v60 = vmul.f32 %v2758_v46, %v77_v44  ;;  %v91_v36 = vld [vmem:[%s3522_s1 + $0xc0] sm:$0xff] }
  0x7f   :  { %v198_v63 = vadd.f32 %v170_v53, %v126_v52  ;;  %v199_v1 = vadd.f32 %v171_v55, %v127_v54  ;;  %v133_v29 = vmul.f32 %v2734_v35, %v53_v11  ;;  %v140_v30 = vmul.f32 %v2789_v13, %v60_v12 }
  0x80   :  { %v200_v3 = vadd.f32 %v172_v58, %v128_v57  ;;  %v201_v5 = vadd.f32 %v173_v60, %v129_v59  ;;  %v141_v32 = vmul.f32 %v2789_v13, %v61_v19  ;;  %v135_v37 = vmul.f32 %v2734_v35, %v55_v20 }
  0x81   :  { %v219_v6 = vpack.c.bf16 %v198_v63, %v191_v62  ;;  %v220_v7 = vpack.c.bf16 %v199_v1, %v192_v0  ;;  %v50_v63 = vld [vmem:[%s3521_s0 + $0x58] sm:$0xff]  ;;  %v51_v1 = vld [vmem:[%s3521_s0 + $0x60] sm:$0xff] }
  0x82   :  { %v221_v9 = vpack.c.bf16 %v200_v3, %v193_v2  ;;  %v222_v10 = vpack.c.bf16 %v201_v5, %v194_v4  ;;  %v2859_v0 = vld [vmem:[%s3522_s1 + $0x58] sm:$0xff]  ;;  %v2867_v2 = vld [vmem:[%s3522_s1 + $0x60] sm:$0xff]  ;;  %v52_v4 = vld [vmem:[%s3521_s0 + $0x68] sm:$0xff]  ;;  %v131_v11 = vmul.f32 %v2760_v47, %v51_v1 }
  0x83   :  { %879 = vmatmul.bf16.vlgmr.msra.gmra.mxu2 %v219_v6  ;;  %898 = vmatmul.bf16.vlgmr.msra.gmra.mxu3 %v220_v7  ;;  %v43_v3 = vld [vmem:[%s3521_s0 + $0x20] sm:$0xff]  ;;  %v2878_v5 = vld [vmem:[%s3522_s1 + $0x68] sm:$0xff]  ;;  %v175_v12 = vmul.f32 %v2758_v46, %v2867_v2  ;;  %v132_v16 = vmul.f32 %v2760_v47, %v52_v4 }
  0x84   :  { %917 = vmatmul.bf16.vlgmr.msrb.gmra.mxu0 %v221_v9  ;;  %936 = vmatmul.bf16.vlgmr.msrb.gmra.mxu1 %v222_v10  ;;  %v2815_v24 = vpop.permute.xlu1 %160  ;;  %v2883_v6 = vld [vmem:[%s3522_s1 + $0x20] sm:$0xff]  ;;  %v44_v7 = vld [vmem:[%s3521_s0 + $0x28] sm:$0xff]  ;;  %v130_v9 = vmul.f32 %v2760_v47, %v50_v63  ;;  %v174_v10 = vmul.f32 %v2758_v46, %v2859_v0  ;;  %v176_v19 = vmul.f32 %v2758_v46, %v2878_v5 }
  0x85   :  { %v2817_v25 = vpop.permute.xlu0 %156  ;;  %v184_v42 = vmul.f32 %v2815_v24, %v88_v15  ;;  %v185_v44 = vmul.f32 %v2815_v24, %v89_v27  ;;  %v186_v48 = vmul.f32 %v2815_v24, %v90_v33  ;;  %v187_v50 = vmul.f32 %v2815_v24, %v91_v36  ;;  %v2905_v15 = vld [vmem:[%s3522_s1 + $0x30] sm:$0xff] }
  0x86   :  { %v177_v41 = vmul.f32 %v2817_v25, %v81_v14  ;;  %v178_v43 = vmul.f32 %v2817_v25, %v82_v26  ;;  %v179_v45 = vmul.f32 %v2817_v25, %v83_v28  ;;  %v180_v49 = vmul.f32 %v2817_v25, %v84_v34  ;;  %v45_v14 = vld [vmem:[%s3521_s0 + $0x30] sm:$0xff] }
  0x87   :  { %v212_v52 = vadd.f32 %v184_v42, %v140_v30  ;;  %v213_v54 = vadd.f32 %v185_v44, %v141_v32  ;;  %v214_v56 = vadd.f32 %v186_v48, %v142_v38  ;;  %v215_v58 = vadd.f32 %v187_v50, %v143_v40  ;;  %v57_v36 = vld [vmem:[%s3521_s0 + $0x90] sm:$0xff]  ;;  %v58_v38 = vld [vmem:[%s3521_s0 + $0x98] sm:$0xff]  ;;  %v59_v42 = vld [vmem:[%s3521_s0 + $0xa0] sm:$0xff] }
  0x88   :  { %v205_v51 = vadd.f32 %v177_v41, %v133_v29  ;;  %v206_v53 = vadd.f32 %v178_v43, %v134_v31  ;;  %v207_v55 = vadd.f32 %v179_v45, %v135_v37  ;;  %v208_v57 = vadd.f32 %v180_v49, %v136_v39  ;;  %v2933_v37 = vld [vmem:[%s3522_s1 + $0xc8] sm:$0xff]  ;;  %v65_v39 = vld [vmem:[%s3521_s0 + $0xd0] sm:$0xff]  ;;  %v2944_v40 = vld [vmem:[%s3522_s1 + $0x98] sm:$0xff] }
  0x89   :  { %v123_v20 = vmul.f32 %v2684_v18, %v43_v3  ;;  %v167_v21 = vmul.f32 %v2682_v17, %v2883_v6  ;;  %v124_v22 = vmul.f32 %v2684_v18, %v44_v7  ;;  %v125_v26 = vmul.f32 %v2684_v18, %v45_v14  ;;  %v2928_v18 = vld [vmem:[%s3522_s1 + $0x90] sm:$0xff]  ;;  %v66_v43 = vld [vmem:[%s3521_s0 + $0xd8] sm:$0xff]  ;;  %v2960_v44 = vld [vmem:[%s3522_s1 + $0xa0] sm:$0xff] }
  0x8a   :  { %v226_v59 = vpack.c.bf16 %v212_v52, %v205_v51  ;;  %v227_v60 = vpack.c.bf16 %v213_v54, %v206_v53  ;;  %v228_v61 = vpack.c.bf16 %v214_v56, %v207_v55  ;;  %v229_v62 = vpack.c.bf16 %v215_v58, %v208_v57  ;;  %v2949_v41 = vld [vmem:[%s3522_s1 + $0xd0] sm:$0xff]  ;;  %v2965_v45 = vld [vmem:[%s3522_s1 + $0xd8] sm:$0xff]  ;;  %v2191_v14 = vld [vmem:[%s3528_s7 + $0x188] sm:$0xf] }
  0x8b   :  { %v169_v27 = vmul.f32 %v2682_v17, %v2905_v15  ;;  %v202_v28 = vadd.f32 %v174_v10, %v130_v9  ;;  %v203_v47 = vadd.f32 %v175_v12, %v131_v11  ;;  %v204_v29 = vadd.f32 %v176_v19, %v132_v16  ;;  %v64_v17 = vld [vmem:[%s3521_s0 + $0xc8] sm:$0xff]  ;;  %v2346_v19 = vld [vmem:[%s3528_s7 + $0x1a0] sm:$0xf0] }
  0x8c   :  { %v195_v30 = vadd.f32 %v167_v21, %v123_v20  ;;  %v196_v46 = vadd.f32 %v168_v23, %v124_v22  ;;  %v137_v48 = vmul.f32 %v2734_v35, %v57_v36  ;;  %v144_v49 = vmul.f32 %v2789_v13, %v64_v17  ;;  %v2343_v11 = vld [vmem:[%s3528_s7 + $0x18c] sm:$0xf]  ;;  %v2193_v12 = vld [vmem:[%s3528_s7 + $0x1a4] sm:$0xf0]  ;;  %v2199_v20 = vld [vmem:[%s3528_s7 + $0x190] sm:$0xf] }
  0x8d   :  { %v197_v31 = vadd.f32 %v169_v27, %v125_v26  ;;  %v138_v50 = vmul.f32 %v2734_v35, %v58_v38  ;;  %v145_v51 = vmul.f32 %v2789_v13, %v65_v39  ;;  %v181_v52 = vmul.f32 %v2817_v25, %v2928_v18  ;;  %v2347_v21 = vld [vmem:[%s3528_s7 + $0x1a8] sm:$0xf0]  ;;  %v2344_v26 = vld [vmem:[%s3528_s7 + $0x194] sm:$0xf]  ;;  %v2201_v27 = vld [vmem:[%s3528_s7 + $0x1ac] sm:$0xf0] }
  0x8e   :  { %v223_v32 = vpack.c.bf16 %v202_v28, %v195_v30  ;;  %v224_v33 = vpack.c.bf16 %v203_v47, %v196_v46  ;;  %v188_v53 = vmul.f32 %v2815_v24, %v2933_v37  ;;  %v182_v54 = vmul.f32 %v2817_v25, %v2944_v40  ;;  %v2336_v30 = vld [vmem:[%s3528_s7 + $0x154] sm:$0xf]  ;;  %v2165_v46 = vld [vmem:[%s3528_s7 + $0x16c] sm:$0xf0]  ;;  %v2337_v39 = vld [vmem:[%s3528_s7 + $0x15c] sm:$0xf] }
  0x8f   :  { %v225_v34 = vpack.c.bf16 %v204_v29, %v197_v31  ;;  %v189_v55 = vmul.f32 %v2815_v24, %v2949_v41  ;;  %v139_v56 = vmul.f32 %v2734_v35, %v59_v42  ;;  %v146_v57 = vmul.f32 %v2789_v13, %v66_v43  ;;  %v2163_v31 = vld [vmem:[%s3528_s7 + $0x150] sm:$0xf]  ;;  %v2340_v36 = vld [vmem:[%s3528_s7 + $0x170] sm:$0xf0]  ;;  %v2173_v42 = vld [vmem:[%s3528_s7 + $0x174] sm:$0xf0] }
  0x90   :  { %v183_v58 = vmul.f32 %v2817_v25, %v2960_v44  ;;  %v2196_v16 = vor.u32 %v2343_v11, %v2193_v12  ;;  %v2192_v22 = vor.u32 %v2346_v19, %v2191_v14  ;;  %v2200_v23 = vor.u32 %v2347_v21, %v2199_v20  ;;  %v2329_v43 = vld [vmem:[%s3528_s7 + $0x11c] sm:$0xf]  ;;  %v2115_v14 = vld [vmem:[%s3528_s7 + $0xe8] sm:$0xf]  ;;  %v2323_v21 = vld [vmem:[%s3528_s7 + $0xec] sm:$0xf] }
  0x91   :  { %v217_v63 = vadd.f32 %v189_v55, %v145_v51  ;;  %v2204_v28 = vor.u32 %v2344_v26, %v2201_v27  ;;  %v2137_v51 = vld [vmem:[%s3528_s7 + $0x134] sm:$0xf0]  ;;  %v2325_v12 = vld [vmem:[%s3528_s7 + $0xf8] sm:$0xf0]  ;;  %v2081_v27 = vld [vmem:[%s3528_s7 + $0xc4] sm:$0xf0] }
  0x92   :  { %v211_v1 = vadd.f32 %v183_v58, %v139_v56  ;;  %1405 = vmatpush.bf16.msra.mxu2 %v2196_v16  ;;  %1386 = vmatpush.bf16.msra.mxu1 %v2192_v22  ;;  %v2143_v56 = vld [vmem:[%s3528_s7 + $0x120] sm:$0xf]  ;;  %v2330_v58 = vld [vmem:[%s3528_s7 + $0x124] sm:$0xf]  ;;  %v2117_v22 = vld [vmem:[%s3528_s7 + $0x104] sm:$0xf0] }
  0x93   :  { %884 = vmatmul.bf16.gmra.mxu2 %v226_v59  ;;  %903 = vmatmul.bf16.gmra.mxu3 %v227_v60  ;;  %v190_v59 = vmul.f32 %v2815_v24, %v2965_v45  ;;  %v209_v60 = vadd.f32 %v181_v52, %v137_v48  ;;  %v2135_v52 = vld [vmem:[%s3528_s7 + $0x118] sm:$0xf]  ;;  %v2326_v16 = vld [vmem:[%s3528_s7 + $0x100] sm:$0xf0]  ;;  %v2120_v26 = vor.u32 %v2323_v21, %v2117_v22 }
  0x94   :  { %922 = vmatmul.bf16.gmra.mxu0 %v228_v61  ;;  %941 = vmatmul.bf16.gmra.mxu1 %v229_v62  ;;  %v216_v61 = vadd.f32 %v188_v53, %v144_v49  ;;  %v210_v62 = vadd.f32 %v182_v54, %v138_v50  ;;  %v2176_v50 = vor.u32 %v2337_v39, %v2173_v42  ;;  %v2332_v53 = vld [vmem:[%s3528_s7 + $0x130] sm:$0xf0]  ;;  %v2302_v22 = vld [vmem:[%s3528_s7 + $0x44] sm:$0xf] }
  0x95   :  { %v218_v3 = vadd.f32 %v190_v59, %v146_v57  ;;  %1424 = vmatpush.bf16.msra.mxu3 %v2200_v23  ;;  %1443 = vmatpush.bf16.msrb.mxu0 %v2204_v28  ;;  %v2140_v54 = vor.u32 %v2329_v43, %v2137_v51  ;;  %v2136_v55 = vor.u32 %v2332_v53, %v2135_v52  ;;  %v2333_v57 = vld [vmem:[%s3528_s7 + $0x138] sm:$0xf0]  ;;  %v2315_v23 = vld [vmem:[%s3528_s7 + $0xac] sm:$0xf]  ;;  %v2079_v28 = vld [vmem:[%s3528_s7 + $0xa8] sm:$0xf] }
  0x96   :  { %v230_v4 = vpack.c.bf16 %v216_v61, %v209_v60  ;;  %v231_v7 = vpack.c.bf16 %v217_v63, %v210_v62  ;;  %v2144_v59 = vor.u32 %v2333_v57, %v2143_v56  ;;  %v2145_v60 = vld [vmem:[%s3528_s7 + $0x13c] sm:$0xf0]  ;;  %v2116_v20 = vor.u32 %v2326_v16, %v2115_v14  ;;  %v2308_v43 = vld [vmem:[%s3528_s7 + $0x74] sm:$0xf]  ;;  %v2051_v51 = vld [vmem:[%s3528_s7 + $0x70] sm:$0xf] }
  0x97   :  { %v232_v9 = vpack.c.bf16 %v218_v3, %v211_v1  ;;  %v2148_v63 = vor.u32 %v2330_v58, %v2145_v60  ;;  %v2322_v1 = vld [vmem:[%s3528_s7 + $0xe4] sm:$0xf]  ;;  %v2109_v3 = vld [vmem:[%s3528_s7 + $0xfc] sm:$0xf0]  ;;  %v2311_v56 = vld [vmem:[%s3528_s7 + $0x88] sm:$0xf0] }
  0x98   :  { %v2112_v11 = vor.u32 %v2322_v1, %v2109_v3  ;;  %v2059_v57 = vld [vmem:[%s3528_s7 + $0x78] sm:$0xf]  ;;  %v2312_v58 = vld [vmem:[%s3528_s7 + $0x90] sm:$0xf0]  ;;  %v2031_v16 = vld [vmem:[%s3528_s7 + $0x40] sm:$0xf] }
  0x99   :  { %1444 = vmatpush.bf16.msrb.mxu0 %v2176_v50  ;;  %v2053_v50 = vld [vmem:[%s3528_s7 + $0x8c] sm:$0xf0]  ;;  %v2061_v60 = vld [vmem:[%s3528_s7 + $0x94] sm:$0xf0]  ;;  %v2304_v14 = vld [vmem:[%s3528_s7 + $0x50] sm:$0xf0] }
  0x9d   :  { %1445 = vmatpush.bf16.msrb.mxu0 %v2148_v63 }
  0x9f   :  { %v2985_v35 = vpop.f32.mrf.mxu0 }
  0xa0   :  { %v2991_v10 = vpop.f32.mrf.mxu1 }
  0xa1   :  { %1446 = vmatpush.bf16.msrb.mxu0 %v2120_v26  ;;  %v526_v52 = vadd.f32 %v2991_v10, %v2985_v35  ;;  %v2060_v35 = vor.u32 %v2312_v58, %v2059_v57  ;;  %v2309_v10 = vld [vmem:[%s3528_s7 + $0x7c] sm:$0xf]  ;;  %v2348_v58 = vld [vmem:[%s3528_s7 + $0x1b0] sm:$0xf0] }
  0xa2   :  { %v2064_v1 = vor.u32 %v2309_v10, %v2061_v60  ;;  %v2215_v10 = vld [vmem:[%s3528_s7 + $0x1a0] sm:$0xf]  ;;  %v2349_v60 = vld [vmem:[%s3528_s7 + $0x1b8] sm:$0xf0] }
  0xa3   :  { %955 = vmatmul.bf16.vlgmr.msrb.gmra.mxu2 %v223_v32  ;;  %974 = vmatmul.bf16.vlgmr.msrb.gmra.mxu3 %v224_v33  ;;  %v2168_v32 = vor.u32 %v2336_v30, %v2165_v46  ;;  %v2339_v33 = vld [vmem:[%s3528_s7 + $0x168] sm:$0xf0]  ;;  %v2318_v30 = vld [vmem:[%s3528_s7 + $0xc0] sm:$0xf0] }
  0xa4   :  { %993 = vmatmul.bf16.vlgmr.msra.gmra.mxu0 %v225_v34  ;;  %v2171_v34 = vld [vmem:[%s3528_s7 + $0x158] sm:$0xf]  ;;  %v2164_v17 = vor.u32 %v2339_v33, %v2163_v31  ;;  %v2084_v31 = vor.u32 %v2315_v23, %v2081_v27  ;;  %v2087_v33 = vld [vmem:[%s3528_s7 + $0xb0] sm:$0xf]  ;;  %v2033_v23 = vld [vmem:[%s3528_s7 + $0x5c] sm:$0xf0] }
  0xa5   :  { %v2172_v38 = vor.u32 %v2340_v36, %v2171_v34  ;;  %1406 = vmatpush.bf16.msra.mxu2 %v2168_v32  ;;  %v2080_v32 = vor.u32 %v2318_v30, %v2079_v28  ;;  %v2319_v34 = vld [vmem:[%s3528_s7 + $0xc8] sm:$0xf0]  ;;  %v2316_v36 = vld [vmem:[%s3528_s7 + $0xb4] sm:$0xf]  ;;  %v2036_v27 = vor.u32 %v2302_v22, %v2033_v23  ;;  %v2294_v30 = vld [vmem:[%s3528_s7 + $0x4] sm:$0xf] }
  0xa6   :  { %1387 = vmatpush.bf16.msra.mxu1 %v2164_v17  ;;  %v2088_v17 = vor.u32 %v2319_v34, %v2087_v33  ;;  %v2342_v22 = vld [vmem:[%s3528_s7 + $0x180] sm:$0xf0] }
  0xa7   :  { %v2987_v13 = vpop.f32.mrf.mxu0  ;;  %1425 = vmatpush.bf16.msra.mxu3 %v2172_v38  ;;  %v2089_v38 = vld [vmem:[%s3528_s7 + $0xcc] sm:$0xf0] }
  0xa8   :  { %v3019_v47 = vpop.f32.mrf.mxu1  ;;  %v2092_v42 = vor.u32 %v2316_v36, %v2089_v38  ;;  %v2297_v36 = vld [vmem:[%s3528_s7 + $0x18] sm:$0xf0]  ;;  %v2298_v38 = vld [vmem:[%s3528_s7 + $0x20] sm:$0xf0] }
  0xa9   :  { %1407 = vmatpush.bf16.msra.mxu2 %v2140_v54 }
  0xaa   :  { %1388 = vmatpush.bf16.msra.mxu1 %v2136_v55  ;;  %1447 = vmatpush.bf16.msrb.mxu0 %v2092_v42  ;;  %v2056_v55 = vor.u32 %v2308_v43, %v2053_v50  ;;  %v528_v42 = vadd.f32 %v3019_v47, %v2987_v13  ;;  %v2209_v13 = vld [vmem:[%s3528_s7 + $0x1b4] sm:$0xf0] }
  0xab   :  { %1426 = vmatpush.bf16.msra.mxu3 %v2144_v59  ;;  %v2052_v59 = vor.u32 %v2311_v56, %v2051_v51  ;;  %v2295_v51 = vld [vmem:[%s3528_s7 + $0xc] sm:$0xf]  ;;  %v2207_v47 = vld [vmem:[%s3528_s7 + $0x198] sm:$0xf] }
  0xad   :  { %1408 = vmatpush.bf16.msra.mxu2 %v2112_v11  ;;  %v2025_v11 = vld [vmem:[%s3528_s7 + $0x54] sm:$0xf0] }
  0xae   :  { %1448 = vmatpush.bf16.msrb.mxu0 %v2064_v1 }
  0xaf   :  { %v2989_v25 = vpop.f32.mrf.mxu0  ;;  %1427 = vmatpush.bf16.msra.mxu3 %v2116_v20 }
  0xb0   :  { %v3075_v61 = vpop.f32.mrf.mxu1 }
  0xb1   :  { %1409 = vmatpush.bf16.msra.mxu2 %v2084_v31  ;;  %v1997_v31 = vld [vmem:[%s3528_s7 + $0x1c] sm:$0xf0] }
  0xb2   :  { %1449 = vmatpush.bf16.msrb.mxu0 %v2036_v27  ;;  %v2000_v34 = vor.u32 %v2294_v30, %v1997_v31  ;;  %v2331_v30 = vld [vmem:[%s3528_s7 + $0x12c] sm:$0xf]  ;;  %v2153_v31 = vld [vmem:[%s3528_s7 + $0x144] sm:$0xf0] }
  0xb3   :  { %960 = vmatmul.bf16.gmra.mxu2 %v230_v4  ;;  %979 = vmatmul.bf16.gmra.mxu3 %v231_v7  ;;  %v2107_v4 = vld [vmem:[%s3528_s7 + $0xe0] sm:$0xf] }
  0xb4   :  { %998 = vmatmul.bf16.gmra.mxu0 %v232_v9  ;;  %v2108_v19 = vor.u32 %v2325_v12, %v2107_v4  ;;  %1428 = vmatpush.bf16.msra.mxu3 %v2088_v17  ;;  %v2301_v4 = vld [vmem:[%s3528_s7 + $0x3c] sm:$0xf]  ;;  %v2023_v12 = vld [vmem:[%s3528_s7 + $0x38] sm:$0xf]  ;;  %v2003_v17 = vld [vmem:[%s3528_s7 + $0x8] sm:$0xf] }
  0xb5   :  { %1410 = vmatpush.bf16.msra.mxu2 %v2056_v55  ;;  %v2024_v20 = vor.u32 %v2304_v14, %v2023_v12  ;;  %v2004_v50 = vor.u32 %v2298_v38, %v2003_v17  ;;  %v2345_v55 = vld [vmem:[%s3528_s7 + $0x19c] sm:$0xf]  ;;  %v2181_v12 = vld [vmem:[%s3528_s7 + $0x17c] sm:$0xf0]  ;;  %v531_v14 = vadd.f32 %v3075_v61, %v2989_v25 }
  0xb6   :  { %1389 = vmatpush.bf16.msra.mxu1 %v2108_v19  ;;  %v2305_v19 = vld [vmem:[%s3528_s7 + $0x58] sm:$0xf0] }
  0xb7   :  { %v2993_v24 = vpop.f32.mrf.mxu0  ;;  %v2032_v21 = vor.u32 %v2305_v19, %v2031_v16 }
  0xb8   :  { %v3133_v39 = vpop.f32.mrf.mxu1  ;;  %1429 = vmatpush.bf16.msra.mxu3 %v2060_v35  ;;  %v2212_v35 = vor.u32 %v2345_v55, %v2209_v13  ;;  %v2328_v13 = vld [vmem:[%s3528_s7 + $0x110] sm:$0xf0] }
  0xba   :  { %1390 = vmatpush.bf16.msra.mxu1 %v2080_v32  ;;  %v1995_v32 = vld [vmem:[%s3528_s7] sm:$0xf] }
  0xbb   :  { %v1996_v43 = vor.u32 %v2297_v36, %v1995_v32  ;;  %v2151_v32 = vld [vmem:[%s3528_s7 + $0x128] sm:$0xf]  ;;  %v2335_v36 = vld [vmem:[%s3528_s7 + $0x148] sm:$0xf0] }
  0xbc   :  { %1430 = vmatpush.bf16.msra.mxu3 %v2032_v21  ;;  %v2187_v21 = vld [vmem:[%s3528_s7 + $0x168] sm:$0xf] }
  0xbd   :  { %v2188_v27 = vor.u32 %v2342_v22, %v2187_v21  ;;  %v2069_v22 = vld [vmem:[%s3528_s7 + $0x9c] sm:$0xf0] }
  0xbe   :  { %1391 = vmatpush.bf16.msra.mxu1 %v2052_v59 }
  0xc0   :  { %1431 = vmatpush.bf16.msra.mxu3 %v2004_v50  ;;  %v2125_v50 = vld [vmem:[%s3528_s7 + $0x10c] sm:$0xf0] }
  0xc2   :  { %1392 = vmatpush.bf16.msra.mxu1 %v2024_v20 }
  0xc6   :  { %1393 = vmatpush.bf16.msra.mxu1 %v1996_v43  ;;  %v2324_v43 = vld [vmem:[%s3528_s7 + $0xf4] sm:$0xf] }
  0xc7   :  { %v2128_v55 = vor.u32 %v2324_v43, %v2125_v50 }
 0x101   :  { %v3021_v29 = vpop.f32.mrf.mxu0  ;;  %v937_v28 = vpop.f32.mrf.mxu1 }
 0x106   :  { %v3050_v48 = vpop.f32.mrf.mxu2  ;;  %v3052_v49 = vpop.f32.mrf.mxu3 }
 0x107   :  { %v881_v63 = vadd.f32 %v3050_v48, %v526_v52  ;;  %v2028_v48 = vor.u32 %v2301_v4, %v2025_v11  ;;  %v2005_v52 = vld [vmem:[%s3528_s7 + $0x24] sm:$0xf0]  ;;  %v2338_v11 = vld [vmem:[%s3528_s7 + $0x164] sm:$0xf] }
 0x108   :  { %v2008_v57 = vor.u32 %v2295_v51, %v2005_v52  ;;  %v2184_v20 = vor.u32 %v2338_v11, %v2181_v12  ;;  %v2123_v51 = vld [vmem:[%s3528_s7 + $0xf0] sm:$0xf]  ;;  %v2103_v11 = vld [vmem:[%s3528_s7 + $0xc0] sm:$0xf]  ;;  %v2321_v12 = vld [vmem:[%s3528_s7 + $0xd8] sm:$0xf0] }
 0x109   :  { %v3077_v62 = vpop.f32.mrf.mxu0  ;;  %v900_v26 = vadd.f32 %v3052_v49, %v881_v63  ;;  %1411 = vmatpush.bf16.msra.mxu2 %v2028_v48  ;;  %v2216_v63 = vor.u32 %v2349_v60, %v2215_v10  ;;  %v2179_v48 = vld [vmem:[%s3528_s7 + $0x160] sm:$0xf]  ;;  %v2095_v10 = vld [vmem:[%s3528_s7 + $0xb8] sm:$0xf]  ;;  %v533_v60 = vadd.f32 %v3133_v39, %v2993_v24  ;;  %v2104_v21 = vor.u32 %v2321_v12, %v2103_v11 }
 0x10a   :  { %1450 = vmatpush.bf16.msrb.mxu0 %v2008_v57  ;;  %v2131_v57 = vld [vmem:[%s3528_s7 + $0xf8] sm:$0xf] }
 0x10b   :  { %v919_v56 = vadd.f32 %v3021_v29, %v900_v26  ;;  %v2208_v29 = vor.u32 %v2348_v58, %v2207_v47  ;;  %1500 = vmatpush.bf16.msrb.mxu3 %v2216_v63 }
 0x10d   :  { %1412 = vmatpush.bf16.msra.mxu2 %v2000_v34  ;;  %1462 = vmatpush.bf16.msrb.mxu1 %v2208_v29  ;;  %v938_v4 = vadd.f32 %v937_v28, %v919_v56  ;;  %v939_v28 = vpop.f32.mrf.mxu1  ;;  %v2156_v34 = vor.u32 %v2331_v30, %v2153_v31  ;;  %v2327_v56 = vld [vmem:[%s3528_s7 + $0x108] sm:$0xf0]  ;;  %v2097_v29 = vld [vmem:[%s3528_s7 + $0xd4] sm:$0xf0] }
 0x10e   :  { %v3088_v7 = vpop.f32.mrf.mxu2  ;;  %v3090_v9 = vpop.f32.mrf.mxu3 }
 0x10f   :  { %v883_v59 = vadd.f32 %v3088_v7, %v528_v42  ;;  %1501 = vmatpush.bf16.msrb.mxu3 %v2188_v27  ;;  %v2314_v27 = vld [vmem:[%s3528_s7 + $0xa0] sm:$0xf0] }
 0x111   :  { %v3119_v46 = vpop.f32.mrf.mxu0  ;;  %1481 = vmatpush.bf16.msrb.mxu2 %v2212_v35  ;;  %v902_v7 = vadd.f32 %v3090_v9, %v883_v59  ;;  %v2341_v9 = vld [vmem:[%s3528_s7 + $0x178] sm:$0xf0]  ;;  %v2124_v59 = vor.u32 %v2327_v56, %v2123_v51 }
 0x112   :  { %v2180_v26 = vor.u32 %v2341_v9, %v2179_v48  ;;  %v2317_v35 = vld [vmem:[%s3528_s7 + $0xbc] sm:$0xf] }
 0x113   :  { %v921_v61 = vadd.f32 %v3077_v62, %v902_v7  ;;  %v2159_v62 = vld [vmem:[%s3528_s7 + $0x130] sm:$0xf] }
 0x114   :  { %1463 = vmatpush.bf16.msrb.mxu1 %v2180_v26  ;;  %v2160_v42 = vor.u32 %v2335_v36, %v2159_v62  ;;  %v2075_v26 = vld [vmem:[%s3528_s7 + $0x88] sm:$0xf]  ;;  %v2303_v62 = vld [vmem:[%s3528_s7 + $0x4c] sm:$0xf] }
 0x115   :  { %1482 = vmatpush.bf16.msrb.mxu2 %v2184_v20  ;;  %v940_v58 = vadd.f32 %v939_v28, %v921_v61 }
 0x116   :  { %v3146_v53 = vpop.f32.mrf.mxu2  ;;  %v3148_v54 = vpop.f32.mrf.mxu3  ;;  %1502 = vmatpush.bf16.msrb.mxu3 %v2160_v42  ;;  %v2306_v42 = vld [vmem:[%s3528_s7 + $0x60] sm:$0xf0] }
 0x117   :  { %v886_v25 = vadd.f32 %v3146_v53, %v531_v14  ;;  %v2334_v53 = vld [vmem:[%s3528_s7 + $0x140] sm:$0xf0]  ;;  %v3326_v14 = vld [vmem:[%s3527_s6] ss:$0 sm:$0xff] }
 0x118   :  { %v2152_v38 = vor.u32 %v2334_v53, %v2151_v32  ;;  %v2076_v53 = vor.u32 %v2314_v27, %v2075_v26 }
 0x119   :  { %v3166_v3 = vpop.f32.mrf.mxu0  ;;  %v905_v52 = vadd.f32 %v3148_v54, %v886_v25  ;;  %1483 = vmatpush.bf16.msrb.mxu2 %v2156_v34  ;;  %v2132_v54 = vor.u32 %v2328_v13, %v2131_v57 }
 0x11a   :  { %1464 = vmatpush.bf16.msrb.mxu1 %v2152_v38  ;;  %v2041_v38 = vld [vmem:[%s3528_s7 + $0x64] sm:$0xf0] }
 0x11b   :  { %v924_v39 = vadd.f32 %v3119_v46, %v905_v52  ;;  %1503 = vmatpush.bf16.msrb.mxu3 %v2132_v54  ;;  %v2067_v46 = vld [vmem:[%s3528_s7 + $0x80] sm:$0xf]  ;;  %v2047_v52 = vld [vmem:[%s3528_s7 + $0x50] sm:$0xf] }
 0x11d   :  { %1484 = vmatpush.bf16.msrb.mxu2 %v2128_v55  ;;  %v2307_v55 = vld [vmem:[%s3528_s7 + $0x68] sm:$0xf0] }
 0x11e   :  { %v3202_v33 = vpop.f32.mrf.mxu2  ;;  %v3204_v49 = vpop.f32.mrf.mxu3  ;;  %1465 = vmatpush.bf16.msrb.mxu1 %v2124_v59  ;;  %v2296_v59 = vld [vmem:[%s3528_s7 + $0x14] sm:$0xf]  ;;  %v2048_v54 = vor.u32 %v2307_v55, %v2047_v52  ;;  %v2362_v52 = vld [vmem:[%s3522_s1] sm:$0xff] }
 0x11f   :  { %1504 = vmatpush.bf16.msrb.mxu3 %v2104_v21 }
 0x121   :  { %v994_v1 = vpop.f32.mrf.mxu0 }
 0x123   :  { %1505 = vmatpush.bf16.msrb.mxu3 %v2076_v53 }
 0x126   :  { %v956_v16 = vpop.f32.mrf.mxu2  ;;  %v975_v19 = vpop.f32.mrf.mxu3 }
 0x127   :  { %v957_v23 = vadd.f32 %v956_v16, %v938_v4  ;;  %v2320_v4 = vld [vmem:[%s3528_s7 + $0xd0] sm:$0xf0]  ;;  %v888_v16 = vadd.f32 %v3202_v33, %v533_v60  ;;  %v942_v33 = vpop.f32.mrf.mxu1  ;;  %v2019_v60 = vld [vmem:[%s3528_s7 + $0x18] sm:$0xf]  ;;  %1506 = vmatpush.bf16.msrb.mxu3 %v2048_v54 }
 0x128   :  { %v2096_v9 = vor.u32 %v2320_v4, %v2095_v10  ;;  %v943_v30 = vadd.f32 %v942_v33, %v924_v39 }
 0x129   :  { %v976_v17 = vadd.f32 %v975_v19, %v957_v23  ;;  %v996_v47 = vpop.f32.mrf.mxu0  ;;  %v2100_v19 = vor.u32 %v2317_v35, %v2097_v29  ;;  %v2313_v23 = vld [vmem:[%s3528_s7 + $0x98] sm:$0xf0]  ;;  %v907_v61 = vadd.f32 %v3204_v49, %v888_v16  ;;  %v2039_v49 = vld [vmem:[%s3528_s7 + $0x48] sm:$0xf]  ;;  %v2013_v35 = vld [vmem:[%s3528_s7 + $0x2c] sm:$0xf0] }
 0x12a   :  { %1466 = vmatpush.bf16.msrb.mxu1 %v2096_v9  ;;  %v2068_v34 = vor.u32 %v2313_v23, %v2067_v46  ;;  %v2299_v29 = vld [vmem:[%s3528_s7 + $0x28] sm:$0xf0]  ;;  %v2016_v11 = vor.u32 %v2296_v59, %v2013_v35 }
 0x12b   :  { %v995_v48 = vadd.f32 %v994_v1, %v976_v17  ;;  %v2310_v1 = vld [vmem:[%s3528_s7 + $0x84] sm:$0xf]  ;;  %1485 = vmatpush.bf16.msrb.mxu2 %v2100_v19  ;;  %v926_v56 = vadd.f32 %v3166_v3, %v907_v61  ;;  %v2011_v3 = vld [vmem:[%s3528_s7 + $0x10] sm:$0xf] }
 0x12c   :  { %v2072_v31 = vor.u32 %v2310_v1, %v2069_v22  ;;  %v2012_v12 = vor.u32 %v2299_v29, %v2011_v3  ;;  %v2363_v3 = vld [vmem:[%s3522_s1 + $0x10] sm:$0xff] }
 0x12d   :  { %v1008_v28 = vadd.f32 %v3326_v14, %v995_v48 }
 0x12e   :  { %v958_v63 = vpop.f32.mrf.mxu2  ;;  %v977_v7 = vpop.f32.mrf.mxu3  ;;  %1467 = vmatpush.bf16.msrb.mxu1 %v2068_v34 }
 0x12f   :  { %v959_v24 = vadd.f32 %v958_v63, %v940_v58  ;;  %v1012_v43 = vmax.f32 %v1008_v28, 0.0  ;;  %1486 = vmatpush.bf16.msrb.mxu2 %v2072_v31  ;;  %v2040_v58 = vor.u32 %v2306_v42, %v2039_v49  ;;  %v2300_v63 = vld [vmem:[%s3528_s7 + $0x30] sm:$0xf0]  ;;  %v2361_v42 = vld [vmem:[%s3522_s1 + $0x8] sm:$0xff] }
 0x131   :  { %v978_v20 = vadd.f32 %v977_v7, %v959_v24  ;;  %v999_v57 = vpop.f32.mrf.mxu0  ;;  %v944_v7 = vpop.f32.mrf.mxu1  ;;  %v2020_v24 = vor.u32 %v2300_v63, %v2019_v60 }
 0x132   :  { %v945_v4 = vadd.f32 %v944_v7, %v926_v56  ;;  %1468 = vmatpush.bf16.msrb.mxu1 %v2040_v58 }
 0x133   :  { %v997_v25 = vadd.f32 %v996_v47, %v978_v20  ;;  %v2044_v47 = vor.u32 %v2303_v62, %v2041_v38  ;;  %1507 = vmatpush.bf16.msrb.mxu3 %v2020_v24 }
 0x135   :  { %v1009_v32 = vadd.f32 %v3326_v14, %v997_v25  ;;  %1487 = vmatpush.bf16.msrb.mxu2 %v2044_v47 }
 0x136   :  { %v961_v36 = vpop.f32.mrf.mxu2  ;;  %v980_v17 = vpop.f32.mrf.mxu3  ;;  %1469 = vmatpush.bf16.msrb.mxu1 %v2012_v12  ;;  %v2364_v12 = vld [vmem:[%s3522_s1 + $0x18] sm:$0xff] }
 0x137   :  { %v1013_v50 = vmax.f32 %v1009_v32, 0.0  ;;  %v962_v51 = vadd.f32 %v961_v36, %v943_v30  ;;  %v1520_v30 = vlaneseq }
 0x139   :  { %v1016_v13 = vpack.c.bf16 %v1013_v50, %v1012_v43  ;;  %v981_v10 = vadd.f32 %v980_v17, %v962_v51  ;;  %1488 = vmatpush.bf16.msrb.mxu2 %v2016_v11  ;;  %v1001_v9 = vpop.f32.mrf.mxu0  ;;  %v1521_v62 = vshrl.u32 %v1520_v30, 7 }
 0x13b   :  { %1394 = vmatmul.bf16.vlgmr.msra.gmra.mxu1 %v1016_v13  ;;  %1413 = vmatmul.bf16.vlgmr.msra.gmra.mxu2 %v1016_v13  ;;  %v1000_v39 = vadd.f32 %v999_v57, %v981_v10  ;;  %vm1530_vm0 = vcmp.lt.s32.totalorder %v1521_v62, 2 }
 0x13c   :  { %1432 = vmatmul.bf16.vlgmr.msra.gmra.mxu3 %v1016_v13  ;;  %1451 = vmatmul.bf16.vlgmr.msrb.gmra.mxu0 %v1016_v13 }
 0x13d   :  { %v1010_v21 = vadd.f32 %v3326_v14, %v1000_v39 }
 0x13e   :  { %v963_v48 = vpop.f32.mrf.mxu2  ;;  %v982_v19 = vpop.f32.mrf.mxu3 }
 0x13f   :  { %v964_v16 = vadd.f32 %v963_v48, %v945_v4  ;;  %v1014_v46 = vmax.f32 %v1010_v21, 0.0 }
 0x141   :  { %v983_v20 = vadd.f32 %v982_v19, %v964_v16 }
 0x143   :  { %v1002_v1 = vadd.f32 %v1001_v9, %v983_v20 }
 0x145   :  { %v1011_v22 = vadd.f32 %v3326_v14, %v1002_v1  ;;  %v1082_v14 = vld [vmem:[%s3529_s8] sm:$0xff] }
 0x146   :  { %v3393_v31 = vperm.slane %v1082_v14, 1  ;;  %v3397_v53 = vperm.slane %v1082_v14, 0  ;;  %v3401_v38 = vperm.slane %v1082_v14, 2  ;;  %v3415_v56 = vperm.slane %v1082_v14, 3 }
 0x147   :  { %v1015_v33 = vmax.f32 %v1011_v22, 0.0  ;;  %v3423_v10 = vperm.slane %v1082_v14, 4  ;;  %v3434_v20 = vperm.slane %v1082_v14, 5  ;;  %v3436_v9 = vperm.slane %v1082_v14, 6  ;;  %v2365_v14 = vld [vmem:[%s3522_s1 + $0x38] sm:$0xff] }
 0x149   :  { %v1017_v23 = vpack.c.bf16 %v1015_v33, %v1014_v46 }
 0x14b   :  { %1399 = vmatmul.bf16.gmra.mxu1 %v1017_v23  ;;  %1418 = vmatmul.bf16.gmra.mxu2 %v1017_v23 }
 0x14c   :  { %1437 = vmatmul.bf16.gmra.mxu3 %v1017_v23  ;;  %1456 = vmatmul.bf16.gmra.mxu0 %v1017_v23 }
 0x15b   :  { %1470 = vmatmul.bf16.vlgmr.msrb.gmra.mxu1 %v1016_v13  ;;  %1489 = vmatmul.bf16.vlgmr.msrb.gmra.mxu2 %v1016_v13 }
 0x15c   :  { %1508 = vmatmul.bf16.vlgmr.msrb.gmra.mxu3 %v1016_v13  ;;  %v2405_v13 = vmov 0.0  }
 0x15d   :  { %v2217_v47 = vsel %vm1530_vm0, 1.0, %v2405_v13  ;;  %38 = vst.msk [vmem:[#allocation2] sm:$0x1] %vm37_vm1, %v2405_v13 }
 0x16b   :  { %1475 = vmatmul.bf16.gmra.mxu1 %v1017_v23  ;;  %1494 = vmatmul.bf16.gmra.mxu2 %v1017_v23 }
 0x16c   :  { %1513 = vmatmul.bf16.gmra.mxu3 %v1017_v23 }
 0x1b8   :  { %v1395_v26 = vpop.f32.mrf.mxu1 }
 0x1b9   :  { %v1396_v17 = vadd.f32 %v1395_v26, %v3397_v53  ;;  %v1452_v58 = vpop.f32.mrf.mxu0 }
 0x1ba   :  { %v1453_v35 = vadd.f32 %v1452_v58, %v3415_v56 }
 0x1bb   :  { %v1542_v55 = vsub.f32 %v1396_v17, %v2362_v52 }
 0x1bc   :  { %v1545_v48 = vsub.f32 %v1453_v35, %v2364_v12 }
 0x1bd   :  { %v1570_v54 = vmul.f32 %v2217_v47, %v1542_v55 }
 0x1be   :  { %v1414_v27 = vpop.f32.mrf.mxu2  ;;  %v1573_v21 = vmul.f32 %v2217_v47, %v1545_v48 }
 0x1bf   :  { %v1433_v28 = vpop.f32.mrf.mxu3  ;;  %v1415_v36 = vadd.f32 %v1414_v27, %v3393_v31  ;;  %v1599_v11 = vmul.f32 %v1570_v54, %v1570_v54 }
 0x1c0   :  { %v1397_v25 = vpop.f32.mrf.mxu1  ;;  %v1434_v57 = vadd.f32 %v1433_v28, %v3401_v38 }
 0x1c1   :  { %v1543_v43 = vsub.f32 %v1415_v36, %v2361_v42  ;;  %v1398_v22 = vadd.f32 %v1397_v25, %v3397_v53  ;;  %v1454_v26 = vpop.f32.mrf.mxu0  ;;  %v1602_v36 = vmul.f32 %v1573_v21, %v1573_v21 }
 0x1c2   :  { %v1544_v29 = vsub.f32 %v1434_v57, %v2363_v3 }
 0x1c3   :  { %v1571_v59 = vmul.f32 %v2217_v47, %v1543_v43  ;;  %v1549_v17 = vsub.f32 %v1398_v22, %v2365_v14  ;;  %v1455_v43 = vadd.f32 %v1454_v26, %v3415_v56 }
 0x1c4   :  { %v1572_v24 = vmul.f32 %v2217_v47, %v1544_v29 }
 0x1c5   :  { %v1600_v63 = vmul.f32 %v1571_v59, %v1571_v59  ;;  %v2367_v59 = vld [vmem:[%s3522_s1 + $0x48] sm:$0xff]  ;;  %v1577_v3 = vmul.f32 0.0, %v1549_v17 }
 0x1c6   :  { %v1416_v61 = vpop.f32.mrf.mxu2  ;;  %v1601_v1 = vmul.f32 %v1572_v24, %v1572_v24 }
 0x1c7   :  { %v1435_v32 = vpop.f32.mrf.mxu3  ;;  %v1627_v16 = vadd.f32 %v1600_v63, %v1599_v11  ;;  %v1417_v27 = vadd.f32 %v1416_v61, %v3393_v31  ;;  %v1606_v21 = vmul.f32 %v1577_v3, %v1577_v3 }
 0x1c8   :  { %v3395_v34 = vpop.f32.mrf.mxu1  ;;  %v1436_v62 = vadd.f32 %v1435_v32, %v3401_v38  ;;  %v2366_v32 = vld [vmem:[%s3522_s1 + $0x40] sm:$0xff] }
 0x1c9   :  { %v1628_v23 = vadd.f32 %v1627_v16, %v1601_v1  ;;  %v1550_v55 = vsub.f32 %v1417_v27, %v2366_v32 }
 0x1ca   :  { %v1551_v54 = vsub.f32 %v1436_v62, %v2367_v59 }
 0x1cb   :  { %v1629_v57 = vadd.f32 %v1628_v23, %v1602_v36  ;;  %v1578_v12 = vmul.f32 0.0, %v1550_v55  ;;  %v1401_v23 = vadd.f32 %v3395_v34, %v3397_v53  ;;  %v2369_v34 = vld [vmem:[%s3522_s1 + $0x70] sm:$0xff] }
 0x1ce   :  { %v3403_v49 = vpop.f32.mrf.mxu2 }
 0x1cf   :  { %v3408_v50 = vpop.f32.mrf.mxu3  ;;  %v1420_v62 = vadd.f32 %v3403_v49, %v3393_v31  ;;  %v2370_v49 = vld [vmem:[%s3522_s1 + $0x78] sm:$0xff] }
 0x1d0   :  { %v3410_v51 = vpop.f32.mrf.mxu1 }
 0x1d6   :  { %v3425_v60 = vpop.f32.mrf.mxu2 }
 0x1d7   :  { %v3427_v7 = vpop.f32.mrf.mxu3 }
 0x1d8   :  { %v1471_v4 = vpop.f32.mrf.mxu1 }
 0x1d9   :  { %v1472_v39 = vadd.f32 %v1471_v4, %v3423_v10 }
 0x1db   :  { %v1546_v19 = vsub.f32 %v1472_v39, %v2883_v6 }
 0x1dd   :  { %v1574_v46 = vmul.f32 %v2217_v47, %v1546_v19  ;;  %v1579_v19 = vmul.f32 0.0, %v1551_v54 }
 0x1de   :  { %v1490_v33 = vpop.f32.mrf.mxu2 }
 0x1df   :  { %v1491_v28 = vadd.f32 %v1490_v33, %v3434_v20  ;;  %v1509_v30 = vpop.f32.mrf.mxu3  ;;  %v1603_v25 = vmul.f32 %v1574_v46, %v1574_v46  ;;  %v1607_v33 = vmul.f32 %v1578_v12, %v1578_v12 }
 0x1e0   :  { %v1510_v6 = vadd.f32 %v1509_v30, %v3436_v9  ;;  %v1473_v52 = vpop.f32.mrf.mxu1  ;;  %v1457_v30 = vpop.f32.mrf.mxu0 }
 0x1e1   :  { %v1547_v42 = vsub.f32 %v1491_v28, %v2891_v8  ;;  %v1630_v8 = vadd.f32 %v1629_v57, %v1603_v25  ;;  %v1474_v63 = vadd.f32 %v1473_v52, %v3423_v10  ;;  %v1608_v28 = vmul.f32 %v1579_v19, %v1579_v19 }
 0x1e2   :  { %v1548_v61 = vsub.f32 %v1510_v6, %v2905_v15  ;;  %v2368_v15 = vld [vmem:[%s3522_s1 + $0x50] sm:$0xff]  ;;  %v1556_v25 = vsub.f32 %v1401_v23, %v2369_v34  ;;  %v1557_v52 = vsub.f32 %v1420_v62, %v2370_v49 }
 0x1e3   :  { %v1575_v58 = vmul.f32 %v2217_v47, %v1547_v42  ;;  %v1552_v4 = vsub.f32 %v1455_v43, %v2368_v15  ;;  %v1553_v1 = vsub.f32 %v1474_v63, %v2859_v0  ;;  %v1439_v0 = vadd.f32 %v3408_v50, %v3401_v38  ;;  %v2371_v50 = vld [vmem:[%s3522_s1 + $0x80] sm:$0xff] }
 0x1e4   :  { %v1576_v35 = vmul.f32 %v2217_v47, %v1548_v61  ;;  %v1458_v43 = vadd.f32 %v1457_v30, %v3415_v56  ;;  %v1584_v59 = vmul.f32 0.0, %v1556_v25  ;;  %v1585_v15 = vmul.f32 0.0, %v1557_v52 }
 0x1e5   :  { %v1604_v29 = vmul.f32 %v1575_v58, %v1575_v58  ;;  %v1580_v46 = vmul.f32 0.0, %v1552_v4  ;;  %v1581_v36 = vmul.f32 0.0, %v1553_v1  ;;  %v1558_v57 = vsub.f32 %v1439_v0, %v2371_v50 }
 0x1e6   :  { %v1492_v11 = vpop.f32.mrf.mxu2  ;;  %v1605_v24 = vmul.f32 %v1576_v35, %v1576_v35  ;;  %v1614_v1 = vmul.f32 %v1585_v15, %v1585_v15 }
 0x1e7   :  { %v1631_v48 = vadd.f32 %v1630_v8, %v1604_v29  ;;  %v1493_v39 = vadd.f32 %v1492_v11, %v3434_v20  ;;  %v1511_v16 = vpop.f32.mrf.mxu3  ;;  %v1609_v17 = vmul.f32 %v1580_v46, %v1580_v46  ;;  %v2372_v8 = vld [vmem:[%s3522_s1 + $0x88] sm:$0xff] }
 0x1e8   :  { %v1512_v22 = vadd.f32 %v1511_v16, %v3436_v9  ;;  %v1476_v61 = vpop.f32.mrf.mxu1  ;;  %v1559_v29 = vsub.f32 %v1458_v43, %v2372_v8  ;;  %v1459_v23 = vpop.f32.mrf.mxu0  ;;  %v2376_v43 = vld [vmem:[%s3522_s1 + $0xc0] sm:$0xff] }
 0x1e9   :  { %v1632_v47 = vadd.f32 %v1631_v48, %v1605_v24  ;;  %v1554_v27 = vsub.f32 %v1493_v39, %v2867_v2  ;;  %v1477_v3 = vadd.f32 %v1476_v61, %v3423_v10  ;;  %v1586_v48 = vmul.f32 0.0, %v1558_v57 }
 0x1ea   :  { %v1555_v14 = vsub.f32 %v1512_v22, %v2878_v5  ;;  %v1610_v5 = vmul.f32 %v1581_v36, %v1581_v36  ;;  %v1613_v24 = vmul.f32 %v1584_v59, %v1584_v59  ;;  %v1460_v36 = vadd.f32 %v1459_v23, %v3415_v56  ;;  %v1598_v23 = vld [vmem:[#allocation2] sm:$0x1] }
 0x1eb   :  { %v1633_v26 = vadd.f32 %v1632_v47, %v1606_v21  ;;  %v1582_v2 = vmul.f32 0.0, %v1554_v27  ;;  %v1560_v16 = vsub.f32 %v1477_v3, %v2928_v18  ;;  %v1403_v21 = vadd.f32 %v3410_v51, %v3397_v53  ;;  %v2373_v18 = vld [vmem:[%s3522_s1 + $0xa8] sm:$0xff] }
 0x1ec   :  { %v1583_v55 = vmul.f32 0.0, %v1555_v14  ;;  %v1587_v47 = vmul.f32 0.0, %v1559_v29  ;;  %v1441_v51 = vadd.f32 %v3427_v7, %v3401_v38  ;;  %v1566_v61 = vsub.f32 %v1460_v36, %v2376_v43 }
 0x1ed   :  { %v1634_v6 = vadd.f32 %v1633_v26, %v1607_v33  ;;  %v1611_v35 = vmul.f32 %v1582_v2, %v1582_v2  ;;  %v1615_v33 = vmul.f32 %v1586_v48, %v1586_v48  ;;  %v1422_v26 = vadd.f32 %v3425_v60, %v3393_v31  ;;  %v2374_v31 = vld [vmem:[%s3522_s1 + $0xb0] sm:$0xff] }
 0x1ee   :  { %v1495_v58 = vpop.f32.mrf.mxu2  ;;  %v1612_v11 = vmul.f32 %v1583_v55, %v1583_v55  ;;  %v1563_v62 = vsub.f32 %v1403_v21, %v2373_v18  ;;  %v1616_v53 = vmul.f32 %v1587_v47, %v1587_v47 }
 0x1ef   :  { %v1635_v42 = vadd.f32 %v1634_v6, %v1608_v28  ;;  %v1514_v63 = vpop.f32.mrf.mxu3  ;;  %v1496_v12 = vadd.f32 %v1495_v58, %v3434_v20  ;;  %v1588_v28 = vmul.f32 0.0, %v1560_v16  ;;  %v1564_v60 = vsub.f32 %v1422_v26, %v2374_v31 }
 0x1f0   :  { %v1515_v19 = vadd.f32 %v1514_v63, %v3436_v9  ;;  %v1478_v14 = vpop.f32.mrf.mxu1  ;;  %v1591_v34 = vmul.f32 0.0, %v1563_v62 }
 0x1f1   :  { %v1636_v32 = vadd.f32 %v1635_v42, %v1609_v17  ;;  %v1561_v46 = vsub.f32 %v1496_v12, %v2944_v40  ;;  %v2375_v42 = vld [vmem:[%s3522_s1 + $0xb8] sm:$0xff]  ;;  %v1479_v56 = vadd.f32 %v1478_v14, %v3423_v10  ;;  %v1592_v52 = vmul.f32 0.0, %v1564_v60 }
 0x1f2   :  { %v1562_v30 = vsub.f32 %v1515_v19, %v2960_v44  ;;  %v1617_v44 = vmul.f32 %v1588_v28, %v1588_v28  ;;  %v1565_v38 = vsub.f32 %v1441_v51, %v2375_v42  ;;  %v1620_v50 = vmul.f32 %v1591_v34, %v1591_v34 }
 0x1f3   :  { %v1637_v54 = vadd.f32 %v1636_v32, %v1610_v5  ;;  %v1589_v40 = vmul.f32 0.0, %v1561_v46  ;;  %v1567_v59 = vsub.f32 %v1479_v56, %v2933_v37  ;;  %v1621_v10 = vmul.f32 %v1592_v52, %v1592_v52 }
 0x1f4   :  { %v1590_v17 = vmul.f32 0.0, %v1562_v30  ;;  %v1593_v57 = vmul.f32 0.0, %v1565_v38 }
 0x1f5   :  { %v1638_v4 = vadd.f32 %v1637_v54, %v1611_v35  ;;  %v1618_v2 = vmul.f32 %v1589_v40, %v1589_v40  ;;  %v1594_v35 = vmul.f32 0.0, %v1566_v61  ;;  %v1595_v15 = vmul.f32 0.0, %v1567_v59 }
 0x1f6   :  { %v1497_v25 = vpop.f32.mrf.mxu2  ;;  %v1619_v32 = vmul.f32 %v1590_v17, %v1590_v17  ;;  %v1622_v29 = vmul.f32 %v1593_v57, %v1593_v57 }
 0x1f7   :  { %v1639_v39 = vadd.f32 %v1638_v4, %v1612_v11  ;;  %v1516_v49 = vpop.f32.mrf.mxu3  ;;  %v1498_v55 = vadd.f32 %v1497_v25, %v3434_v20  ;;  %v1623_v11 = vmul.f32 %v1594_v35, %v1594_v35  ;;  %v1624_v48 = vmul.f32 %v1595_v15, %v1595_v15 }
 0x1f8   :  { %v1517_v54 = vadd.f32 %v1516_v49, %v3436_v9 }
 0x1f9   :  { %v1640_v22 = vadd.f32 %v1639_v39, %v1613_v24  ;;  %v1568_v8 = vsub.f32 %v1498_v55, %v2949_v41 }
 0x1fa   :  { %v1569_v4 = vsub.f32 %v1517_v54, %v2965_v45 }
 0x1fb   :  { %v1641_v27 = vadd.f32 %v1640_v22, %v1614_v1  ;;  %v1596_v12 = vmul.f32 0.0, %v1568_v8 }
 0x1fc   :  { %v1597_v24 = vmul.f32 0.0, %v1569_v4 }
 0x1fd   :  { %v1642_v6 = vadd.f32 %v1641_v27, %v1615_v33  ;;  %v1625_v16 = vmul.f32 %v1596_v12, %v1596_v12 }
 0x1fe   :  { %v1626_v19 = vmul.f32 %v1597_v24, %v1597_v24 }
 0x1ff   :  { %v1643_v0 = vadd.f32 %v1642_v6, %v1616_v53 }
 0x201   :  { %v1644_v7 = vadd.f32 %v1643_v0, %v1617_v44 }
 0x203   :  { %v1645_v5 = vadd.f32 %v1644_v7, %v1618_v2 }
 0x205   :  { %v1646_v58 = vadd.f32 %v1645_v5, %v1619_v32 }
 0x207   :  { %v1647_v3 = vadd.f32 %v1646_v58, %v1620_v50 }
 0x209   :  { %v1648_v63 = vadd.f32 %v1647_v3, %v1621_v10 }
 0x20b   :  { %v1649_v20 = vadd.f32 %v1648_v63, %v1622_v29 }
 0x20d   :  { %v1650_v39 = vadd.f32 %v1649_v20, %v1623_v11 }
 0x20f   :  { %v1651_v37 = vadd.f32 %v1650_v39, %v1624_v48 }
 0x211   :  { %v1652_v9 = vadd.f32 %v1651_v37, %v1625_v16 }
 0x213   :  { %v1653_v21 = vadd.f32 %v1652_v9, %v1626_v19 }
 0x215   :  { %1654 = vadd.xlane.f32.xlu2 %v1653_v21 }
 0x288   :  { %v1655_v41 = vpop.xlane.xlu2 %1654 }
 0x289   :  { %v1656_v47 = vrot.slane %v1655_v41, 4 }
 0x28b   :  { %v1657_v1 = vadd.f32 %v1656_v47, %v1655_v41 }
 0x28d   :  { %v1658_v45 = vrot.slane %v1657_v1, 2 }
 0x28f   :  { %v1659_v22 = vadd.f32 %v1658_v45, %v1657_v1 }
 0x291   :  { %v1660_v46 = vrot.slane %v1659_v22, 1 }
 0x293   :  { %v1661_v33 = vadd.f32 %v1660_v46, %v1659_v22 }
 0x295   :  { %2350 = vpush %v1661_v33 }
 0x2c6   :  { %s2351_s1 = spop %2350 }
 0x2c7   :  { %v1663_v26 = vstv %s2351_s1 }
 0x2c8   :  { %v1664_v27 = vadd.f32 %v1663_v26, %v1598_v23 }
 0x2ca   :  { %1666 = vst.msk [vmem:[#allocation2] sm:$0x1] %vm37_vm1, %v1664_v27 }
 0x2d1   :  { %v1670_v13 = vld [vmem:[#allocation2] sm:$0x1] }
 0x2d2   :  { %v1671_v28 = vmul.f32 0.0006377551, %v1670_v13 }
 0x2d4   :  { %1672 = vst.msk [vmem:[#allocation2] sm:$0x1] %vm37_vm1, %v1671_v28 }
 0x2d5   :  { %1683 = dma.vmem_to_hbm [thread:$0]  %s1679_s21, 16, %s1681_s24, [#allocation3]  }
 0x2d6   :  { %2401 = dma.done.wait [#allocation3], 16  }
 0x2d7   :  { %2402 = vsyncadd [#allocation3], 4294967280 }
 0x2d8   :  { %1688 = vsyncpa [#allocation3], 1 }

</bundles_post_ra>
